<compile_context>
chip_gen: v7x
topology: tpu7x:2x2x1
jax: 0.10.0
libtpu: 0.0.40
codegen_flags: <defaults>
</compile_context>

<pallas_src>
import math
import numpy as np
import jax
import jax.numpy as jnp
from jax.experimental import pallas as pl
from jax.experimental.pallas import tpu as pltpu

# FrEIA GLOWCouplingBlock constants (module passes clamp=2.0).
# TWO_OVER_PI is FrEIA's literal 0.636, NOT 2/pi — keep the literal so the
# kernel matches FrEIA-trained weights.
CLAMP = 2.0
TWO_OVER_PI = 0.636


# ----------------------------------------------------------------------------
# Kernel
# ----------------------------------------------------------------------------
def make_inn_kernel(num_layers, half, perms_np, use_static_unroll):
    """Kernel over a (ndim_tot, TILE_B) tile: features on sublanes, batch on lanes."""
    # Plain Python floats only: jnp scalar constructors create jax Arrays that
    # Pallas rejects as captured kernel constants.
    K_OUT = float(CLAMP * TWO_OVER_PI)       # soft-clamp output scale (signed)
    PI_2 = 1.5707963267948966
    PI_4 = 0.7853981633974483
    TAN_3PI_8 = 2.414213562373095
    TAN_PI_8 = 0.4142135623730951

    def soft_clamp_exp(s):
        """exp(CLAMP * 0.636 * atan(s_orig / CLAMP)).
        `s` is already s_orig/CLAMP (input scale folded into the weights that
        produce it); the CLAMP*0.636 output scale is folded into +-K_OUT.
        Cephes atan polynomial + range reduction; the two reduction branches
        are disjoint, so a SINGLE approx EUP reciprocal serves both."""
        sgn_k = jnp.where(s >= 0.0, K_OUT, -K_OUT)
        ax = jnp.abs(s)
        big = ax > TAN_3PI_8
        mid = jnp.logical_and(ax > TAN_PI_8, jnp.logical_not(big))
        denom = jnp.where(big, ax, ax + 1.0)       # big: 1/ax (>2.4), else 1/(ax+1) (>=1)
        inv = pl.reciprocal(denom, approx=True)    # one EUP push per element
        xr = jnp.where(big, -inv, jnp.where(mid, (ax - 1.0) * inv, ax))
        y0 = jnp.where(big, PI_2, jnp.where(mid, PI_4, 0.0))
        z = xr * xr
        p = (((8.05374449538e-2 * z - 1.38776856032e-1) * z
              + 1.99777106478e-1) * z - 3.33329491539e-1) * z * xr + xr
        return jnp.exp(sgn_k * (y0 + p))

    def couple(x1, x2, w2a, b2a, w2b, b2b, w1a, b1a, w1b, b1b):
        # GLOW coupling; bf16 MXU operands (native pass), f32 accumulation,
        # f32 biases / elementwise / soft-clamp.
        a2 = jnp.maximum(
            jnp.dot(w2a, x2.astype(jnp.bfloat16),
                    preferred_element_type=jnp.float32) + b2a, 0.0)
        r2 = jnp.dot(w2b, a2.astype(jnp.bfloat16),
                     preferred_element_type=jnp.float32) + b2b
        y1 = soft_clamp_exp(r2[:half, :]) * x1 + r2[half:, :]
        a1 = jnp.maximum(
            jnp.dot(w1a, y1.astype(jnp.bfloat16),
                    preferred_element_type=jnp.float32) + b1a, 0.0)
        r1 = jnp.dot(w1b, a1.astype(jnp.bfloat16),
                     preferred_element_type=jnp.float32) + b1b
        y2 = soft_clamp_exp(r1[:half, :]) * x2 + r1[half:, :]
        return y1, y2

    if use_static_unroll:
        def kernel(x_ref, s2w1, s2b1, s2w2, s2b2, s1w1, s1b1, s1w2, s1b2, o_ref):
            x1 = x_ref[:half, :]
            x2 = x_ref[half:, :]
            for k in range(num_layers):
                y1, y2 = couple(x1, x2, s2w1[k], s2b1[k], s2w2[k], s2b2[k],
                                s1w1[k], s1b1[k], s1w2[k], s1b2[k])
                # PermuteRandom: compile-time sublane gather (row slices +
                # concat) — no one-hot matmul, no `perm` operand.
                rows = []
                for p in perms_np[k]:
                    p = int(p)
                    src, q = (y1, p) if p < half else (y2, p - half)
                    rows.append(src[q:q + 1, :])
                x1 = jnp.concatenate(rows[:half], axis=0)
                x2 = jnp.concatenate(rows[half:], axis=0)
            o_ref[...] = jnp.concatenate([x1, x2], axis=0).astype(o_ref.dtype)
    else:
        # Deep stacks: rolled loop with partial unroll (bounded code size /
        # vreg live ranges).  The permutation must be data here (layer index is
        # a tracer), so it stays a bf16 one-hot matmul.
        def kernel(x_ref, s2w1, s2b1, s2w2, s2b2, s1w1, s1b1, s1w2, s1b2,
                   perm, o_ref):
            def body(k, h):
                y1, y2 = couple(h[:half, :], h[half:, :],
                                s2w1[k], s2b1[k], s2w2[k], s2b2[k],
                                s1w1[k], s1b1[k], s1w2[k], s1b2[k])
                hc = jnp.concatenate([y1, y2], axis=0)
                return jnp.dot(perm[k], hc.astype(jnp.bfloat16),
                               preferred_element_type=jnp.float32)
            h = jax.lax.fori_loop(0, num_layers, body, x_ref[...], unroll=2)
            o_ref[...] = h.astype(o_ref.dtype)

    return kernel


# ----------------------------------------------------------------------------
# Parameters: torch-equivalent init + kernel packing (transpose + folds + bf16)
# ----------------------------------------------------------------------------
def init_inn_params(key, ndim_tot, hidden, num_layers):
    """Synthetic params mirroring nn.Linear default init, in torch-style
    x @ W + b layout (used directly by the pure-JAX reference)."""
    assert ndim_tot % 2 == 0
    half = ndim_tot // 2

    def linear(k, fan_in, fan_out):
        kw, kb = jax.random.split(k)
        bound = 1.0 / math.sqrt(fan_in)
        w = jax.random.uniform(kw, (fan_in, fan_out), jnp.float32, -bound, bound)
        b = jax.random.uniform(kb, (1, fan_out), jnp.float32, -bound, bound)
        return w, b

    lists = {n: [] for n in ("s2w1", "s2b1", "s2w2", "s2b2",
                             "s1w1", "s1b1", "s1w2", "s1b2")}
    perms = []
    for k in range(num_layers):
        key, k1, k2, k3, k4 = jax.random.split(key, 5)
        w, b = linear(k1, half, hidden);      lists["s2w1"].append(w); lists["s2b1"].append(b)
        w, b = linear(k2, hidden, ndim_tot);  lists["s2w2"].append(w); lists["s2b2"].append(b)
        w, b = linear(k3, half, hidden);      lists["s1w1"].append(w); lists["s1b1"].append(b)
        w, b = linear(k4, hidden, ndim_tot);  lists["s1w2"].append(w); lists["s1b2"].append(b)
        perms.append(np.random.RandomState(k).permutation(ndim_tot))  # PermuteRandom(seed=k)

    ref_params = {n: jnp.stack(v) for n, v in lists.items()}
    return ref_params, perms


def pack_params_for_kernel(ref_params, perms, ndim_tot):
    """Pack for the transposed lane-dense kernel layout:
       * W -> W^T (out_features, in_features) in bf16 (native MXU pass),
         biases -> f32 column vectors (added after f32 accumulation),
       * fold 1/CLAMP (exact power of two) into the rows producing s,
       * one-hot permutation matrices kept only for the deep (rolled) path."""
    half = ndim_tot // 2

    def pack_subnet(w1, b1, w2, b2):
        k_w1 = np.transpose(np.asarray(w1), (0, 2, 1)).copy()   # (L, H, half)
        k_b1 = np.transpose(np.asarray(b1), (0, 2, 1)).copy()   # (L, H, 1)
        k_w2 = np.transpose(np.asarray(w2), (0, 2, 1)).copy()   # (L, D, H)
        k_b2 = np.transpose(np.asarray(b2), (0, 2, 1)).copy()   # (L, D, 1)
        k_w2[:, :half, :] /= CLAMP          # soft-clamp input scale fold
        k_b2[:, :half, :] /= CLAMP
        return k_w1, k_b1, k_w2, k_b2

    s2 = pack_subnet(ref_params["s2w1"], ref_params["s2b1"],
                     ref_params["s2w2"], ref_params["s2b2"])
    s1 = pack_subnet(ref_params["s1w1"], ref_params["s1b1"],
                     ref_params["s1w2"], ref_params["s1b2"])

    names = ("s2w1", "s2b1", "s2w2", "s2b2", "s1w1", "s1b1", "s1w2", "s1b2")
    packed = {}
    for n, a in zip(names, s2 + s1):
        dt = jnp.float32 if n.endswith(("b1", "b2")) else jnp.bfloat16
        packed[n] = jnp.asarray(a, dtype=dt)
    if perms:
        P = np.stack([np.eye(ndim_tot, dtype=np.float32)[np.asarray(p)] for p in perms])
    else:
        P = np.zeros((0, ndim_tot, ndim_tot), np.float32)
    packed["perm"] = jnp.asarray(P, dtype=jnp.bfloat16)   # exact 0/1 in bf16
    return packed


# ----------------------------------------------------------------------------
# pallas_call wrapper
# ----------------------------------------------------------------------------
def inn_forward_pallas(x, kparams, perms, num_layers, ndim_tot,
                       tile_b=None, static_unroll_max=8):
    B = x.shape[0]
    D = ndim_tot
    half = D // 2
    hidden = int(kparams["s2w1"].shape[1])
    use_static = num_layers <= static_unroll_max

    # Batch tiling: lane-aligned tiles, >= 2 tiles and an even tile count so the
    # "parallel" batch axis shards evenly across both TensorCores on v7x;
    # candidate sizes chosen to minimize last-tile padding.
    if tile_b is None:
        best = None
        for cand in (128, 256, 384, 512):
            nt = max(2, (B + cand - 1) // cand)
            nt += nt % 2
            bp = nt * cand
            if best is None or bp < best[0]:
                best = (bp, cand, nt)
        Bp, tile_b, n_tiles = best
    else:
        n_tiles = max(2, (B + tile_b - 1) // tile_b)
        n_tiles += n_tiles % 2
        Bp = n_tiles * tile_b

    # Wrapper-side layout: batch -> lanes, features -> sublanes (one transpose,
    # pad along lanes).  A consumer that accepts (D, Bp) could skip the final
    # transpose; we return (B, D) to match the module's forward.
    xt = jnp.pad(x.astype(jnp.float32).T, ((0, 0), (0, Bp - B)))

    weight_names = ["s2w1", "s2b1", "s2w2", "s2b2", "s1w1", "s1b1", "s1w2", "s1b2"]
    if not use_static:
        weight_names.append("perm")
    weights = [kparams[n] for n in weight_names]
    weight_bytes = sum(int(np.prod(w.shape)) * w.dtype.itemsize for w in weights)

    io_spec = pl.BlockSpec((D, tile_b), lambda i: (0, i))
    # whole-array weight blocks with a constant block index -> copied to VMEM once
    weight_specs = [pl.BlockSpec(w.shape, lambda i, nd=w.ndim: (0,) * nd)
                    for w in weights]

    # VMEM budget: resident weights + double-buffered I/O tiles + per-layer live
    # intermediates (relu acts, subnet outputs, soft-clamp temps) with spill
    # headroom; clamped under the 64 MiB v7x physical cap.
    io_tile_bytes = D * tile_b * 4
    interm_bytes = (hidden + 2 * D) * tile_b * 4
    needed = weight_bytes + 4 * io_tile_bytes + 4 * interm_bytes + (16 << 20)
    vmem_limit = int(min(48 << 20, max(24 << 20, needed)))

    flops = 2 * Bp * num_layers * 2 * (half * hidden + hidden * D)
    if not use_static:
        flops += 2 * Bp * num_layers * D * D           # one-hot permutation matmul
    transcendentals = 2 * Bp * num_layers * D          # exp + shared recip per s element
    bytes_accessed = 2 * Bp * D * 4 + weight_bytes

    kernel = make_inn_kernel(num_layers, half, perms, use_static)
    out_t = pl.pallas_call(
        kernel,
        out_shape=jax.ShapeDtypeStruct((D, Bp), jnp.float32),
        grid_spec=pltpu.PrefetchScalarGridSpec(
            num_scalar_prefetch=0,
            grid=(n_tiles,),
            in_specs=[io_spec] + weight_specs,
            out_specs=io_spec,
        ),
        compiler_params=pltpu.CompilerParams(
            dimension_semantics=("parallel",),          # 2 TensorCores on v7x
            vmem_limit_bytes=vmem_limit,
        ),
        cost_estimate=pl.CostEstimate(flops=int(flops),
                                      transcendentals=int(transcendentals),
                                      bytes_accessed=int(bytes_accessed)),
    )(xt, *weights)
    return out_t[:, :B].T


# ----------------------------------------------------------------------------
# Pure-JAX reference (torch-layout params, jnp.arctan, fancy-index permute)
# ----------------------------------------------------------------------------
def inn_forward_ref(x, rp, perms, num_layers, ndim_tot):
    half = ndim_tot // 2
    h = x
    for k in range(num_layers):
        x1, x2 = h[:, :half], h[:, half:]
        r2 = (jnp.maximum(x2 @ rp["s2w1"][k] + rp["s2b1"][k], 0.0)
              @ rp["s2w2"][k] + rp["s2b2"][k])
        s2v, t2 = r2[:, :half], r2[:, half:]
        y1 = jnp.exp(CLAMP * TWO_OVER_PI * jnp.arctan(s2v / CLAMP)) * x1 + t2
        r1 = (jnp.maximum(y1 @ rp["s1w1"][k] + rp["s1b1"][k], 0.0)
              @ rp["s1w2"][k] + rp["s1b2"][k])
        s1v, t1 = r1[:, :half], r1[:, half:]
        y2 = jnp.exp(CLAMP * TWO_OVER_PI * jnp.arctan(s1v / CLAMP)) * x2 + t1
        y = jnp.concatenate([y1, y2], axis=1)
        h = y[:, perms[k]]
    return h


if __name__ == "__main__":
    # Small shapes consistent with the module forward (x is (batch, ndim_tot)).
    NDIM_TOT = 16
    HIDDEN = 32
    NUM_COUPLING_LAYERS = 2   # module default is 0 (identity); 2 exercises the math
    BATCH = 8

    key = jax.random.PRNGKey(0)
    kx, kp = jax.random.split(key)
    x = jax.random.normal(kx, (BATCH, NDIM_TOT), dtype=jnp.float32)

    ref_params, perms = init_inn_params(kp, NDIM_TOT, HIDDEN, NUM_COUPLING_LAYERS)
    kparams = pack_params_for_kernel(ref_params, perms, NDIM_TOT)

    out = inn_forward_pallas(x, kparams, perms, NUM_COUPLING_LAYERS, NDIM_TOT)
    out = jax.block_until_ready(out)

    ref = inn_forward_ref(x, ref_params, perms, NUM_COUPLING_LAYERS, NDIM_TOT)
    assert out.shape == (BATCH, NDIM_TOT)
    # bf16 MXU operands + polynomial atan + approx EUP reciprocal vs the f32
    # jnp.arctan reference: agreement ~1e-3; tolerance leaves margin for
    # generation-dependent approx-recip tables.
    assert np.allclose(np.asarray(out), np.asarray(ref), atol=2e-2, rtol=2e-2)

    # TODO(synk): rev=True path (reverse coupling + torch.randn noise injection)
    # and compute_losses are training-time glue, not implemented in the kernel.
    print("KERNEL_OK")
</pallas_src>

<mosaic_0001>
module attributes {stable_mosaic.version = 11 : i64} {
  func.func @kernel(%arg0: i32, %arg1: memref<16x128xf32, #tpu.memory_space<vmem>>, %arg2: memref<2x32x8xbf16, #tpu.memory_space<vmem>>, %arg3: memref<2x32x1xf32, #tpu.memory_space<vmem>>, %arg4: memref<2x16x32xbf16, #tpu.memory_space<vmem>>, %arg5: memref<2x16x1xf32, #tpu.memory_space<vmem>>, %arg6: memref<2x32x8xbf16, #tpu.memory_space<vmem>>, %arg7: memref<2x32x1xf32, #tpu.memory_space<vmem>>, %arg8: memref<2x16x32xbf16, #tpu.memory_space<vmem>>, %arg9: memref<2x16x1xf32, #tpu.memory_space<vmem>>, %arg10: memref<16x128xf32, #tpu.memory_space<vmem>>) attributes {dimension_semantics = [#tpu.dimension_semantics<parallel>], iteration_bounds = array<i64: 2>, scalar_prefetch = 0 : i64, scratch_operands = 0 : i64, tpu.core_type = #tpu.core_type<tc>, window_params = [{transform_indices = @transform_0, window_bounds = array<i64: 16, 128>}, {pipeline_mode = #tpu.pipeline_mode<synchronous>, transform_indices = @transform_1, window_bounds = array<i64: 2, 32, 8>}, {pipeline_mode = #tpu.pipeline_mode<synchronous>, transform_indices = @transform_2, window_bounds = array<i64: 2, 32, 1>}, {pipeline_mode = #tpu.pipeline_mode<synchronous>, transform_indices = @transform_3, window_bounds = array<i64: 2, 16, 32>}, {pipeline_mode = #tpu.pipeline_mode<synchronous>, transform_indices = @transform_4, window_bounds = array<i64: 2, 16, 1>}, {pipeline_mode = #tpu.pipeline_mode<synchronous>, transform_indices = @transform_5, window_bounds = array<i64: 2, 32, 8>}, {pipeline_mode = #tpu.pipeline_mode<synchronous>, transform_indices = @transform_6, window_bounds = array<i64: 2, 32, 1>}, {pipeline_mode = #tpu.pipeline_mode<synchronous>, transform_indices = @transform_7, window_bounds = array<i64: 2, 16, 32>}, {pipeline_mode = #tpu.pipeline_mode<synchronous>, transform_indices = @transform_8, window_bounds = array<i64: 2, 16, 1>}, {transform_indices = @transform_9, window_bounds = array<i64: 16, 128>}]} {
    %c0 = arith.constant 0 : index
    %c0_0 = arith.constant 0 : index
    %0 = vector.load %arg1[%c0, %c0_0] : memref<16x128xf32, #tpu.memory_space<vmem>>, vector<8x128xf32>
    %c8 = arith.constant 8 : index
    %c0_1 = arith.constant 0 : index
    %1 = vector.load %arg1[%c8, %c0_1] : memref<16x128xf32, #tpu.memory_space<vmem>>, vector<8x128xf32>
    %c0_2 = arith.constant 0 : index
    %c0_3 = arith.constant 0 : index
    %c0_4 = arith.constant 0 : index
    %2 = vector.load %arg2[%c0_2, %c0_3, %c0_4] : memref<2x32x8xbf16, #tpu.memory_space<vmem>>, vector<1x32x8xbf16>
    %3 = vector.shape_cast %2 : vector<1x32x8xbf16> to vector<32x8xbf16>
    %c0_5 = arith.constant 0 : index
    %c0_6 = arith.constant 0 : index
    %c0_7 = arith.constant 0 : index
    %4 = vector.load %arg3[%c0_5, %c0_6, %c0_7] : memref<2x32x1xf32, #tpu.memory_space<vmem>>, vector<1x32x1xf32>
    %5 = vector.shape_cast %4 : vector<1x32x1xf32> to vector<32x1xf32>
    %c0_8 = arith.constant 0 : index
    %c0_9 = arith.constant 0 : index
    %c0_10 = arith.constant 0 : index
    %6 = vector.load %arg4[%c0_8, %c0_9, %c0_10] : memref<2x16x32xbf16, #tpu.memory_space<vmem>>, vector<1x16x32xbf16>
    %7 = vector.shape_cast %6 : vector<1x16x32xbf16> to vector<16x32xbf16>
    %c0_11 = arith.constant 0 : index
    %c0_12 = arith.constant 0 : index
    %c0_13 = arith.constant 0 : index
    %8 = vector.load %arg5[%c0_11, %c0_12, %c0_13] : memref<2x16x1xf32, #tpu.memory_space<vmem>>, vector<1x16x1xf32>
    %9 = vector.shape_cast %8 : vector<1x16x1xf32> to vector<16x1xf32>
    %c0_14 = arith.constant 0 : index
    %c0_15 = arith.constant 0 : index
    %c0_16 = arith.constant 0 : index
    %10 = vector.load %arg6[%c0_14, %c0_15, %c0_16] : memref<2x32x8xbf16, #tpu.memory_space<vmem>>, vector<1x32x8xbf16>
    %11 = vector.shape_cast %10 : vector<1x32x8xbf16> to vector<32x8xbf16>
    %c0_17 = arith.constant 0 : index
    %c0_18 = arith.constant 0 : index
    %c0_19 = arith.constant 0 : index
    %12 = vector.load %arg7[%c0_17, %c0_18, %c0_19] : memref<2x32x1xf32, #tpu.memory_space<vmem>>, vector<1x32x1xf32>
    %13 = vector.shape_cast %12 : vector<1x32x1xf32> to vector<32x1xf32>
    %c0_20 = arith.constant 0 : index
    %c0_21 = arith.constant 0 : index
    %c0_22 = arith.constant 0 : index
    %14 = vector.load %arg8[%c0_20, %c0_21, %c0_22] : memref<2x16x32xbf16, #tpu.memory_space<vmem>>, vector<1x16x32xbf16>
    %15 = vector.shape_cast %14 : vector<1x16x32xbf16> to vector<16x32xbf16>
    %c0_23 = arith.constant 0 : index
    %c0_24 = arith.constant 0 : index
    %c0_25 = arith.constant 0 : index
    %16 = vector.load %arg9[%c0_23, %c0_24, %c0_25] : memref<2x16x1xf32, #tpu.memory_space<vmem>>, vector<1x16x1xf32>
    %17 = vector.shape_cast %16 : vector<1x16x1xf32> to vector<16x1xf32>
    %18 = arith.truncf %1 : vector<8x128xf32> to vector<8x128xbf16>
    %cst = arith.constant dense<0.000000e+00> : vector<32x128xf32>
    %19 = tpu.matmul %3, %18, %cst {dimension_numbers = #tpu.dot_dimension_numbers<[1], [0], [0], [1], [0, 0, 1, 1], [], []>} : vector<32x8xbf16>, vector<8x128xbf16>, vector<32x128xf32> -> vector<32x128xf32>
    %20 = vector.broadcast %5 : vector<32x1xf32> to vector<32x128xf32>
    %21 = arith.addf %19, %20 : vector<32x128xf32>
    %cst_26 = arith.constant 0.000000e+00 : f32
    %22 = vector.broadcast %cst_26 : f32 to vector<32x128xf32>
    %23 = arith.maximumf %21, %22 : vector<32x128xf32>
    %24 = arith.truncf %23 : vector<32x128xf32> to vector<32x128xbf16>
    %cst_27 = arith.constant dense<0.000000e+00> : vector<16x128xf32>
    %25 = tpu.matmul %7, %24, %cst_27 {dimension_numbers = #tpu.dot_dimension_numbers<[1], [0], [0], [1], [0, 0, 1, 1], [], []>} : vector<16x32xbf16>, vector<32x128xbf16>, vector<16x128xf32> -> vector<16x128xf32>
    %26 = vector.broadcast %9 : vector<16x1xf32> to vector<16x128xf32>
    %27 = arith.addf %25, %26 : vector<16x128xf32>
    %28 = vector.extract_strided_slice %27 {offsets = [0, 0], sizes = [8, 128], strides = [1, 1]} : vector<16x128xf32> to vector<8x128xf32>
    %cst_28 = arith.constant 0.000000e+00 : f32
    %29 = vector.broadcast %cst_28 : f32 to vector<8x128xf32>
    %30 = arith.cmpf oge, %28, %29 : vector<8x128xf32>
    %cst_29 = arith.constant 1.272000e+00 : f32
    %cst_30 = arith.constant -1.272000e+00 : f32
    %31 = vector.broadcast %cst_29 : f32 to vector<8x128xf32>
    %32 = vector.broadcast %cst_30 : f32 to vector<8x128xf32>
    %33 = arith.select %30, %31, %32 : vector<8x128xi1>, vector<8x128xf32>
    %34 = math.absf %28 : vector<8x128xf32>
    %cst_31 = arith.constant 2.41421366 : f32
    %35 = vector.broadcast %cst_31 : f32 to vector<8x128xf32>
    %36 = arith.cmpf ogt, %34, %35 : vector<8x128xf32>
    %cst_32 = arith.constant 0.414213568 : f32
    %37 = vector.broadcast %cst_32 : f32 to vector<8x128xf32>
    %38 = arith.cmpf ogt, %34, %37 : vector<8x128xf32>
    %cst_33 = arith.constant dense<true> : vector<8x128xi1>
    %39 = arith.xori %36, %cst_33 : vector<8x128xi1>
    %40 = arith.andi %38, %39 : vector<8x128xi1>
    %cst_34 = arith.constant 1.000000e+00 : f32
    %41 = vector.broadcast %cst_34 : f32 to vector<8x128xf32>
    %42 = arith.addf %34, %41 : vector<8x128xf32>
    %43 = arith.select %36, %34, %42 : vector<8x128xi1>, vector<8x128xf32>
    %44 = tpu.reciprocal %43 {approx = true} : vector<8x128xf32> -> vector<8x128xf32>
    %cst_35 = arith.constant 0.000000e+00 : f32
    %45 = vector.broadcast %cst_35 : f32 to vector<8x128xf32>
    %46 = arith.subf %45, %44 : vector<8x128xf32>
    %cst_36 = arith.constant 1.000000e+00 : f32
    %47 = vector.broadcast %cst_36 : f32 to vector<8x128xf32>
    %48 = arith.subf %34, %47 : vector<8x128xf32>
    %49 = arith.mulf %48, %44 : vector<8x128xf32>
    %50 = arith.select %40, %49, %34 : vector<8x128xi1>, vector<8x128xf32>
    %51 = arith.select %36, %46, %50 : vector<8x128xi1>, vector<8x128xf32>
    %cst_37 = arith.constant 0.785398185 : f32
    %cst_38 = arith.constant 0.000000e+00 : f32
    %52 = vector.broadcast %cst_37 : f32 to vector<8x128xf32>
    %53 = vector.broadcast %cst_38 : f32 to vector<8x128xf32>
    %54 = arith.select %40, %52, %53 : vector<8x128xi1>, vector<8x128xf32>
    %cst_39 = arith.constant 1.57079637 : f32
    %55 = vector.broadcast %cst_39 : f32 to vector<8x128xf32>
    %56 = arith.select %36, %55, %54 : vector<8x128xi1>, vector<8x128xf32>
    %57 = arith.mulf %51, %51 : vector<8x128xf32>
    %cst_40 = arith.constant 0.0805374458 : f32
    %58 = vector.broadcast %cst_40 : f32 to vector<8x128xf32>
    %59 = arith.mulf %58, %57 : vector<8x128xf32>
    %cst_41 = arith.constant 0.138776854 : f32
    %60 = vector.broadcast %cst_41 : f32 to vector<8x128xf32>
    %61 = arith.subf %59, %60 : vector<8x128xf32>
    %62 = arith.mulf %61, %57 : vector<8x128xf32>
    %cst_42 = arith.constant 0.199777111 : f32
    %63 = vector.broadcast %cst_42 : f32 to vector<8x128xf32>
    %64 = arith.addf %62, %63 : vector<8x128xf32>
    %65 = arith.mulf %64, %57 : vector<8x128xf32>
    %cst_43 = arith.constant 0.333329499 : f32
    %66 = vector.broadcast %cst_43 : f32 to vector<8x128xf32>
    %67 = arith.subf %65, %66 : vector<8x128xf32>
    %68 = arith.mulf %67, %57 : vector<8x128xf32>
    %69 = arith.mulf %68, %51 : vector<8x128xf32>
    %70 = arith.addf %69, %51 : vector<8x128xf32>
    %71 = arith.addf %56, %70 : vector<8x128xf32>
    %72 = arith.mulf %33, %71 : vector<8x128xf32>
    %73 = math.exp %72 : vector<8x128xf32>
    %74 = arith.mulf %73, %0 : vector<8x128xf32>
    %75 = vector.extract_strided_slice %27 {offsets = [8, 0], sizes = [8, 128], strides = [1, 1]} : vector<16x128xf32> to vector<8x128xf32>
    %76 = arith.addf %74, %75 : vector<8x128xf32>
    %77 = arith.truncf %76 : vector<8x128xf32> to vector<8x128xbf16>
    %cst_44 = arith.constant dense<0.000000e+00> : vector<32x128xf32>
    %78 = tpu.matmul %11, %77, %cst_44 {dimension_numbers = #tpu.dot_dimension_numbers<[1], [0], [0], [1], [0, 0, 1, 1], [], []>} : vector<32x8xbf16>, vector<8x128xbf16>, vector<32x128xf32> -> vector<32x128xf32>
    %79 = vector.broadcast %13 : vector<32x1xf32> to vector<32x128xf32>
    %80 = arith.addf %78, %79 : vector<32x128xf32>
    %cst_45 = arith.constant 0.000000e+00 : f32
    %81 = vector.broadcast %cst_45 : f32 to vector<32x128xf32>
    %82 = arith.maximumf %80, %81 : vector<32x128xf32>
    %83 = arith.truncf %82 : vector<32x128xf32> to vector<32x128xbf16>
    %cst_46 = arith.constant dense<0.000000e+00> : vector<16x128xf32>
    %84 = tpu.matmul %15, %83, %cst_46 {dimension_numbers = #tpu.dot_dimension_numbers<[1], [0], [0], [1], [0, 0, 1, 1], [], []>} : vector<16x32xbf16>, vector<32x128xbf16>, vector<16x128xf32> -> vector<16x128xf32>
    %85 = vector.broadcast %17 : vector<16x1xf32> to vector<16x128xf32>
    %86 = arith.addf %84, %85 : vector<16x128xf32>
    %87 = vector.extract_strided_slice %86 {offsets = [0, 0], sizes = [8, 128], strides = [1, 1]} : vector<16x128xf32> to vector<8x128xf32>
    %cst_47 = arith.constant 0.000000e+00 : f32
    %88 = vector.broadcast %cst_47 : f32 to vector<8x128xf32>
    %89 = arith.cmpf oge, %87, %88 : vector<8x128xf32>
    %cst_48 = arith.constant 1.272000e+00 : f32
    %cst_49 = arith.constant -1.272000e+00 : f32
    %90 = vector.broadcast %cst_48 : f32 to vector<8x128xf32>
    %91 = vector.broadcast %cst_49 : f32 to vector<8x128xf32>
    %92 = arith.select %89, %90, %91 : vector<8x128xi1>, vector<8x128xf32>
    %93 = math.absf %87 : vector<8x128xf32>
    %cst_50 = arith.constant 2.41421366 : f32
    %94 = vector.broadcast %cst_50 : f32 to vector<8x128xf32>
    %95 = arith.cmpf ogt, %93, %94 : vector<8x128xf32>
    %cst_51 = arith.constant 0.414213568 : f32
    %96 = vector.broadcast %cst_51 : f32 to vector<8x128xf32>
    %97 = arith.cmpf ogt, %93, %96 : vector<8x128xf32>
    %cst_52 = arith.constant dense<true> : vector<8x128xi1>
    %98 = arith.xori %95, %cst_52 : vector<8x128xi1>
    %99 = arith.andi %97, %98 : vector<8x128xi1>
    %cst_53 = arith.constant 1.000000e+00 : f32
    %100 = vector.broadcast %cst_53 : f32 to vector<8x128xf32>
    %101 = arith.addf %93, %100 : vector<8x128xf32>
    %102 = arith.select %95, %93, %101 : vector<8x128xi1>, vector<8x128xf32>
    %103 = tpu.reciprocal %102 {approx = true} : vector<8x128xf32> -> vector<8x128xf32>
    %cst_54 = arith.constant 0.000000e+00 : f32
    %104 = vector.broadcast %cst_54 : f32 to vector<8x128xf32>
    %105 = arith.subf %104, %103 : vector<8x128xf32>
    %cst_55 = arith.constant 1.000000e+00 : f32
    %106 = vector.broadcast %cst_55 : f32 to vector<8x128xf32>
    %107 = arith.subf %93, %106 : vector<8x128xf32>
    %108 = arith.mulf %107, %103 : vector<8x128xf32>
    %109 = arith.select %99, %108, %93 : vector<8x128xi1>, vector<8x128xf32>
    %110 = arith.select %95, %105, %109 : vector<8x128xi1>, vector<8x128xf32>
    %cst_56 = arith.constant 0.785398185 : f32
    %cst_57 = arith.constant 0.000000e+00 : f32
    %111 = vector.broadcast %cst_56 : f32 to vector<8x128xf32>
    %112 = vector.broadcast %cst_57 : f32 to vector<8x128xf32>
    %113 = arith.select %99, %111, %112 : vector<8x128xi1>, vector<8x128xf32>
    %cst_58 = arith.constant 1.57079637 : f32
    %114 = vector.broadcast %cst_58 : f32 to vector<8x128xf32>
    %115 = arith.select %95, %114, %113 : vector<8x128xi1>, vector<8x128xf32>
    %116 = arith.mulf %110, %110 : vector<8x128xf32>
    %cst_59 = arith.constant 0.0805374458 : f32
    %117 = vector.broadcast %cst_59 : f32 to vector<8x128xf32>
    %118 = arith.mulf %117, %116 : vector<8x128xf32>
    %cst_60 = arith.constant 0.138776854 : f32
    %119 = vector.broadcast %cst_60 : f32 to vector<8x128xf32>
    %120 = arith.subf %118, %119 : vector<8x128xf32>
    %121 = arith.mulf %120, %116 : vector<8x128xf32>
    %cst_61 = arith.constant 0.199777111 : f32
    %122 = vector.broadcast %cst_61 : f32 to vector<8x128xf32>
    %123 = arith.addf %121, %122 : vector<8x128xf32>
    %124 = arith.mulf %123, %116 : vector<8x128xf32>
    %cst_62 = arith.constant 0.333329499 : f32
    %125 = vector.broadcast %cst_62 : f32 to vector<8x128xf32>
    %126 = arith.subf %124, %125 : vector<8x128xf32>
    %127 = arith.mulf %126, %116 : vector<8x128xf32>
    %128 = arith.mulf %127, %110 : vector<8x128xf32>
    %129 = arith.addf %128, %110 : vector<8x128xf32>
    %130 = arith.addf %115, %129 : vector<8x128xf32>
    %131 = arith.mulf %92, %130 : vector<8x128xf32>
    %132 = math.exp %131 : vector<8x128xf32>
    %133 = arith.mulf %132, %1 : vector<8x128xf32>
    %134 = vector.extract_strided_slice %86 {offsets = [8, 0], sizes = [8, 128], strides = [1, 1]} : vector<16x128xf32> to vector<8x128xf32>
    %135 = arith.addf %133, %134 : vector<8x128xf32>
    %136 = vector.extract_strided_slice %76 {offsets = [1, 0], sizes = [1, 128], strides = [1, 1]} : vector<8x128xf32> to vector<1x128xf32>
    %137 = vector.extract_strided_slice %76 {offsets = [6, 0], sizes = [1, 128], strides = [1, 1]} : vector<8x128xf32> to vector<1x128xf32>
    %138 = vector.extract_strided_slice %135 {offsets = [0, 0], sizes = [1, 128], strides = [1, 1]} : vector<8x128xf32> to vector<1x128xf32>
    %139 = vector.extract_strided_slice %135 {offsets = [1, 0], sizes = [1, 128], strides = [1, 1]} : vector<8x128xf32> to vector<1x128xf32>
    %140 = vector.extract_strided_slice %135 {offsets = [5, 0], sizes = [1, 128], strides = [1, 1]} : vector<8x128xf32> to vector<1x128xf32>
    %141 = vector.extract_strided_slice %76 {offsets = [4, 0], sizes = [1, 128], strides = [1, 1]} : vector<8x128xf32> to vector<1x128xf32>
    %142 = vector.extract_strided_slice %76 {offsets = [2, 0], sizes = [1, 128], strides = [1, 1]} : vector<8x128xf32> to vector<1x128xf32>
    %143 = vector.extract_strided_slice %135 {offsets = [6, 0], sizes = [1, 128], strides = [1, 1]} : vector<8x128xf32> to vector<1x128xf32>
    %144 = vector.extract_strided_slice %135 {offsets = [2, 0], sizes = [1, 128], strides = [1, 1]} : vector<8x128xf32> to vector<1x128xf32>
    %145 = vector.extract_strided_slice %76 {offsets = [7, 0], sizes = [1, 128], strides = [1, 1]} : vector<8x128xf32> to vector<1x128xf32>
    %146 = vector.extract_strided_slice %135 {offsets = [7, 0], sizes = [1, 128], strides = [1, 1]} : vector<8x128xf32> to vector<1x128xf32>
    %147 = vector.extract_strided_slice %135 {offsets = [3, 0], sizes = [1, 128], strides = [1, 1]} : vector<8x128xf32> to vector<1x128xf32>
    %148 = vector.extract_strided_slice %76 {offsets = [3, 0], sizes = [1, 128], strides = [1, 1]} : vector<8x128xf32> to vector<1x128xf32>
    %149 = vector.extract_strided_slice %76 {offsets = [0, 0], sizes = [1, 128], strides = [1, 1]} : vector<8x128xf32> to vector<1x128xf32>
    %150 = vector.extract_strided_slice %76 {offsets = [5, 0], sizes = [1, 128], strides = [1, 1]} : vector<8x128xf32> to vector<1x128xf32>
    %151 = vector.extract_strided_slice %135 {offsets = [4, 0], sizes = [1, 128], strides = [1, 1]} : vector<8x128xf32> to vector<1x128xf32>
    %152 = tpu.concatenate %136, %137, %138, %139, %140, %141, %142, %143 in 0 : vector<1x128xf32>, vector<1x128xf32>, vector<1x128xf32>, vector<1x128xf32>, vector<1x128xf32>, vector<1x128xf32>, vector<1x128xf32>, vector<1x128xf32> -> vector<8x128xf32>
    %153 = tpu.concatenate %144, %145, %146, %147, %148, %149, %150, %151 in 0 : vector<1x128xf32>, vector<1x128xf32>, vector<1x128xf32>, vector<1x128xf32>, vector<1x128xf32>, vector<1x128xf32>, vector<1x128xf32>, vector<1x128xf32> -> vector<8x128xf32>
    %c1 = arith.constant 1 : index
    %c0_63 = arith.constant 0 : index
    %c0_64 = arith.constant 0 : index
    %154 = vector.load %arg2[%c1, %c0_63, %c0_64] : memref<2x32x8xbf16, #tpu.memory_space<vmem>>, vector<1x32x8xbf16>
    %155 = vector.shape_cast %154 : vector<1x32x8xbf16> to vector<32x8xbf16>
    %c1_65 = arith.constant 1 : index
    %c0_66 = arith.constant 0 : index
    %c0_67 = arith.constant 0 : index
    %156 = vector.load %arg3[%c1_65, %c0_66, %c0_67] : memref<2x32x1xf32, #tpu.memory_space<vmem>>, vector<1x32x1xf32>
    %157 = vector.shape_cast %156 : vector<1x32x1xf32> to vector<32x1xf32>
    %c1_68 = arith.constant 1 : index
    %c0_69 = arith.constant 0 : index
    %c0_70 = arith.constant 0 : index
    %158 = vector.load %arg4[%c1_68, %c0_69, %c0_70] : memref<2x16x32xbf16, #tpu.memory_space<vmem>>, vector<1x16x32xbf16>
    %159 = vector.shape_cast %158 : vector<1x16x32xbf16> to vector<16x32xbf16>
    %c1_71 = arith.constant 1 : index
    %c0_72 = arith.constant 0 : index
    %c0_73 = arith.constant 0 : index
    %160 = vector.load %arg5[%c1_71, %c0_72, %c0_73] : memref<2x16x1xf32, #tpu.memory_space<vmem>>, vector<1x16x1xf32>
    %161 = vector.shape_cast %160 : vector<1x16x1xf32> to vector<16x1xf32>
    %c1_74 = arith.constant 1 : index
    %c0_75 = arith.constant 0 : index
    %c0_76 = arith.constant 0 : index
    %162 = vector.load %arg6[%c1_74, %c0_75, %c0_76] : memref<2x32x8xbf16, #tpu.memory_space<vmem>>, vector<1x32x8xbf16>
    %163 = vector.shape_cast %162 : vector<1x32x8xbf16> to vector<32x8xbf16>
    %c1_77 = arith.constant 1 : index
    %c0_78 = arith.constant 0 : index
    %c0_79 = arith.constant 0 : index
    %164 = vector.load %arg7[%c1_77, %c0_78, %c0_79] : memref<2x32x1xf32, #tpu.memory_space<vmem>>, vector<1x32x1xf32>
    %165 = vector.shape_cast %164 : vector<1x32x1xf32> to vector<32x1xf32>
    %c1_80 = arith.constant 1 : index
    %c0_81 = arith.constant 0 : index
    %c0_82 = arith.constant 0 : index
    %166 = vector.load %arg8[%c1_80, %c0_81, %c0_82] : memref<2x16x32xbf16, #tpu.memory_space<vmem>>, vector<1x16x32xbf16>
    %167 = vector.shape_cast %166 : vector<1x16x32xbf16> to vector<16x32xbf16>
    %c1_83 = arith.constant 1 : index
    %c0_84 = arith.constant 0 : index
    %c0_85 = arith.constant 0 : index
    %168 = vector.load %arg9[%c1_83, %c0_84, %c0_85] : memref<2x16x1xf32, #tpu.memory_space<vmem>>, vector<1x16x1xf32>
    %169 = vector.shape_cast %168 : vector<1x16x1xf32> to vector<16x1xf32>
    %170 = arith.truncf %153 : vector<8x128xf32> to vector<8x128xbf16>
    %cst_86 = arith.constant dense<0.000000e+00> : vector<32x128xf32>
    %171 = tpu.matmul %155, %170, %cst_86 {dimension_numbers = #tpu.dot_dimension_numbers<[1], [0], [0], [1], [0, 0, 1, 1], [], []>} : vector<32x8xbf16>, vector<8x128xbf16>, vector<32x128xf32> -> vector<32x128xf32>
    %172 = vector.broadcast %157 : vector<32x1xf32> to vector<32x128xf32>
    %173 = arith.addf %171, %172 : vector<32x128xf32>
    %cst_87 = arith.constant 0.000000e+00 : f32
    %174 = vector.broadcast %cst_87 : f32 to vector<32x128xf32>
    %175 = arith.maximumf %173, %174 : vector<32x128xf32>
    %176 = arith.truncf %175 : vector<32x128xf32> to vector<32x128xbf16>
    %cst_88 = arith.constant dense<0.000000e+00> : vector<16x128xf32>
    %177 = tpu.matmul %159, %176, %cst_88 {dimension_numbers = #tpu.dot_dimension_numbers<[1], [0], [0], [1], [0, 0, 1, 1], [], []>} : vector<16x32xbf16>, vector<32x128xbf16>, vector<16x128xf32> -> vector<16x128xf32>
    %178 = vector.broadcast %161 : vector<16x1xf32> to vector<16x128xf32>
    %179 = arith.addf %177, %178 : vector<16x128xf32>
    %180 = vector.extract_strided_slice %179 {offsets = [0, 0], sizes = [8, 128], strides = [1, 1]} : vector<16x128xf32> to vector<8x128xf32>
    %cst_89 = arith.constant 0.000000e+00 : f32
    %181 = vector.broadcast %cst_89 : f32 to vector<8x128xf32>
    %182 = arith.cmpf oge, %180, %181 : vector<8x128xf32>
    %cst_90 = arith.constant 1.272000e+00 : f32
    %cst_91 = arith.constant -1.272000e+00 : f32
    %183 = vector.broadcast %cst_90 : f32 to vector<8x128xf32>
    %184 = vector.broadcast %cst_91 : f32 to vector<8x128xf32>
    %185 = arith.select %182, %183, %184 : vector<8x128xi1>, vector<8x128xf32>
    %186 = math.absf %180 : vector<8x128xf32>
    %cst_92 = arith.constant 2.41421366 : f32
    %187 = vector.broadcast %cst_92 : f32 to vector<8x128xf32>
    %188 = arith.cmpf ogt, %186, %187 : vector<8x128xf32>
    %cst_93 = arith.constant 0.414213568 : f32
    %189 = vector.broadcast %cst_93 : f32 to vector<8x128xf32>
    %190 = arith.cmpf ogt, %186, %189 : vector<8x128xf32>
    %cst_94 = arith.constant dense<true> : vector<8x128xi1>
    %191 = arith.xori %188, %cst_94 : vector<8x128xi1>
    %192 = arith.andi %190, %191 : vector<8x128xi1>
    %cst_95 = arith.constant 1.000000e+00 : f32
    %193 = vector.broadcast %cst_95 : f32 to vector<8x128xf32>
    %194 = arith.addf %186, %193 : vector<8x128xf32>
    %195 = arith.select %188, %186, %194 : vector<8x128xi1>, vector<8x128xf32>
    %196 = tpu.reciprocal %195 {approx = true} : vector<8x128xf32> -> vector<8x128xf32>
    %cst_96 = arith.constant 0.000000e+00 : f32
    %197 = vector.broadcast %cst_96 : f32 to vector<8x128xf32>
    %198 = arith.subf %197, %196 : vector<8x128xf32>
    %cst_97 = arith.constant 1.000000e+00 : f32
    %199 = vector.broadcast %cst_97 : f32 to vector<8x128xf32>
    %200 = arith.subf %186, %199 : vector<8x128xf32>
    %201 = arith.mulf %200, %196 : vector<8x128xf32>
    %202 = arith.select %192, %201, %186 : vector<8x128xi1>, vector<8x128xf32>
    %203 = arith.select %188, %198, %202 : vector<8x128xi1>, vector<8x128xf32>
    %cst_98 = arith.constant 0.785398185 : f32
    %cst_99 = arith.constant 0.000000e+00 : f32
    %204 = vector.broadcast %cst_98 : f32 to vector<8x128xf32>
    %205 = vector.broadcast %cst_99 : f32 to vector<8x128xf32>
    %206 = arith.select %192, %204, %205 : vector<8x128xi1>, vector<8x128xf32>
    %cst_100 = arith.constant 1.57079637 : f32
    %207 = vector.broadcast %cst_100 : f32 to vector<8x128xf32>
    %208 = arith.select %188, %207, %206 : vector<8x128xi1>, vector<8x128xf32>
    %209 = arith.mulf %203, %203 : vector<8x128xf32>
    %cst_101 = arith.constant 0.0805374458 : f32
    %210 = vector.broadcast %cst_101 : f32 to vector<8x128xf32>
    %211 = arith.mulf %210, %209 : vector<8x128xf32>
    %cst_102 = arith.constant 0.138776854 : f32
    %212 = vector.broadcast %cst_102 : f32 to vector<8x128xf32>
    %213 = arith.subf %211, %212 : vector<8x128xf32>
    %214 = arith.mulf %213, %209 : vector<8x128xf32>
    %cst_103 = arith.constant 0.199777111 : f32
    %215 = vector.broadcast %cst_103 : f32 to vector<8x128xf32>
    %216 = arith.addf %214, %215 : vector<8x128xf32>
    %217 = arith.mulf %216, %209 : vector<8x128xf32>
    %cst_104 = arith.constant 0.333329499 : f32
    %218 = vector.broadcast %cst_104 : f32 to vector<8x128xf32>
    %219 = arith.subf %217, %218 : vector<8x128xf32>
    %220 = arith.mulf %219, %209 : vector<8x128xf32>
    %221 = arith.mulf %220, %203 : vector<8x128xf32>
    %222 = arith.addf %221, %203 : vector<8x128xf32>
    %223 = arith.addf %208, %222 : vector<8x128xf32>
    %224 = arith.mulf %185, %223 : vector<8x128xf32>
    %225 = math.exp %224 : vector<8x128xf32>
    %226 = arith.mulf %225, %152 : vector<8x128xf32>
    %227 = vector.extract_strided_slice %179 {offsets = [8, 0], sizes = [8, 128], strides = [1, 1]} : vector<16x128xf32> to vector<8x128xf32>
    %228 = arith.addf %226, %227 : vector<8x128xf32>
    %229 = arith.truncf %228 : vector<8x128xf32> to vector<8x128xbf16>
    %cst_105 = arith.constant dense<0.000000e+00> : vector<32x128xf32>
    %230 = tpu.matmul %163, %229, %cst_105 {dimension_numbers = #tpu.dot_dimension_numbers<[1], [0], [0], [1], [0, 0, 1, 1], [], []>} : vector<32x8xbf16>, vector<8x128xbf16>, vector<32x128xf32> -> vector<32x128xf32>
    %231 = vector.broadcast %165 : vector<32x1xf32> to vector<32x128xf32>
    %232 = arith.addf %230, %231 : vector<32x128xf32>
    %cst_106 = arith.constant 0.000000e+00 : f32
    %233 = vector.broadcast %cst_106 : f32 to vector<32x128xf32>
    %234 = arith.maximumf %232, %233 : vector<32x128xf32>
    %235 = arith.truncf %234 : vector<32x128xf32> to vector<32x128xbf16>
    %cst_107 = arith.constant dense<0.000000e+00> : vector<16x128xf32>
    %236 = tpu.matmul %167, %235, %cst_107 {dimension_numbers = #tpu.dot_dimension_numbers<[1], [0], [0], [1], [0, 0, 1, 1], [], []>} : vector<16x32xbf16>, vector<32x128xbf16>, vector<16x128xf32> -> vector<16x128xf32>
    %237 = vector.broadcast %169 : vector<16x1xf32> to vector<16x128xf32>
    %238 = arith.addf %236, %237 : vector<16x128xf32>
    %239 = vector.extract_strided_slice %238 {offsets = [0, 0], sizes = [8, 128], strides = [1, 1]} : vector<16x128xf32> to vector<8x128xf32>
    %cst_108 = arith.constant 0.000000e+00 : f32
    %240 = vector.broadcast %cst_108 : f32 to vector<8x128xf32>
    %241 = arith.cmpf oge, %239, %240 : vector<8x128xf32>
    %cst_109 = arith.constant 1.272000e+00 : f32
    %cst_110 = arith.constant -1.272000e+00 : f32
    %242 = vector.broadcast %cst_109 : f32 to vector<8x128xf32>
    %243 = vector.broadcast %cst_110 : f32 to vector<8x128xf32>
    %244 = arith.select %241, %242, %243 : vector<8x128xi1>, vector<8x128xf32>
    %245 = math.absf %239 : vector<8x128xf32>
    %cst_111 = arith.constant 2.41421366 : f32
    %246 = vector.broadcast %cst_111 : f32 to vector<8x128xf32>
    %247 = arith.cmpf ogt, %245, %246 : vector<8x128xf32>
    %cst_112 = arith.constant 0.414213568 : f32
    %248 = vector.broadcast %cst_112 : f32 to vector<8x128xf32>
    %249 = arith.cmpf ogt, %245, %248 : vector<8x128xf32>
    %cst_113 = arith.constant dense<true> : vector<8x128xi1>
    %250 = arith.xori %247, %cst_113 : vector<8x128xi1>
    %251 = arith.andi %249, %250 : vector<8x128xi1>
    %cst_114 = arith.constant 1.000000e+00 : f32
    %252 = vector.broadcast %cst_114 : f32 to vector<8x128xf32>
    %253 = arith.addf %245, %252 : vector<8x128xf32>
    %254 = arith.select %247, %245, %253 : vector<8x128xi1>, vector<8x128xf32>
    %255 = tpu.reciprocal %254 {approx = true} : vector<8x128xf32> -> vector<8x128xf32>
    %cst_115 = arith.constant 0.000000e+00 : f32
    %256 = vector.broadcast %cst_115 : f32 to vector<8x128xf32>
    %257 = arith.subf %256, %255 : vector<8x128xf32>
    %cst_116 = arith.constant 1.000000e+00 : f32
    %258 = vector.broadcast %cst_116 : f32 to vector<8x128xf32>
    %259 = arith.subf %245, %258 : vector<8x128xf32>
    %260 = arith.mulf %259, %255 : vector<8x128xf32>
    %261 = arith.select %251, %260, %245 : vector<8x128xi1>, vector<8x128xf32>
    %262 = arith.select %247, %257, %261 : vector<8x128xi1>, vector<8x128xf32>
    %cst_117 = arith.constant 0.785398185 : f32
    %cst_118 = arith.constant 0.000000e+00 : f32
    %263 = vector.broadcast %cst_117 : f32 to vector<8x128xf32>
    %264 = vector.broadcast %cst_118 : f32 to vector<8x128xf32>
    %265 = arith.select %251, %263, %264 : vector<8x128xi1>, vector<8x128xf32>
    %cst_119 = arith.constant 1.57079637 : f32
    %266 = vector.broadcast %cst_119 : f32 to vector<8x128xf32>
    %267 = arith.select %247, %266, %265 : vector<8x128xi1>, vector<8x128xf32>
    %268 = arith.mulf %262, %262 : vector<8x128xf32>
    %cst_120 = arith.constant 0.0805374458 : f32
    %269 = vector.broadcast %cst_120 : f32 to vector<8x128xf32>
    %270 = arith.mulf %269, %268 : vector<8x128xf32>
    %cst_121 = arith.constant 0.138776854 : f32
    %271 = vector.broadcast %cst_121 : f32 to vector<8x128xf32>
    %272 = arith.subf %270, %271 : vector<8x128xf32>
    %273 = arith.mulf %272, %268 : vector<8x128xf32>
    %cst_122 = arith.constant 0.199777111 : f32
    %274 = vector.broadcast %cst_122 : f32 to vector<8x128xf32>
    %275 = arith.addf %273, %274 : vector<8x128xf32>
    %276 = arith.mulf %275, %268 : vector<8x128xf32>
    %cst_123 = arith.constant 0.333329499 : f32
    %277 = vector.broadcast %cst_123 : f32 to vector<8x128xf32>
    %278 = arith.subf %276, %277 : vector<8x128xf32>
    %279 = arith.mulf %278, %268 : vector<8x128xf32>
    %280 = arith.mulf %279, %262 : vector<8x128xf32>
    %281 = arith.addf %280, %262 : vector<8x128xf32>
    %282 = arith.addf %267, %281 : vector<8x128xf32>
    %283 = arith.mulf %244, %282 : vector<8x128xf32>
    %284 = math.exp %283 : vector<8x128xf32>
    %285 = arith.mulf %284, %153 : vector<8x128xf32>
    %286 = vector.extract_strided_slice %238 {offsets = [8, 0], sizes = [8, 128], strides = [1, 1]} : vector<16x128xf32> to vector<8x128xf32>
    %287 = arith.addf %285, %286 : vector<8x128xf32>
    %288 = vector.extract_strided_slice %228 {offsets = [3, 0], sizes = [1, 128], strides = [1, 1]} : vector<8x128xf32> to vector<1x128xf32>
    %289 = vector.extract_strided_slice %287 {offsets = [5, 0], sizes = [1, 128], strides = [1, 1]} : vector<8x128xf32> to vector<1x128xf32>
    %290 = vector.extract_strided_slice %228 {offsets = [7, 0], sizes = [1, 128], strides = [1, 1]} : vector<8x128xf32> to vector<1x128xf32>
    %291 = vector.extract_strided_slice %228 {offsets = [2, 0], sizes = [1, 128], strides = [1, 1]} : vector<8x128xf32> to vector<1x128xf32>
    %292 = vector.extract_strided_slice %228 {offsets = [6, 0], sizes = [1, 128], strides = [1, 1]} : vector<8x128xf32> to vector<1x128xf32>
    %293 = vector.extract_strided_slice %287 {offsets = [2, 0], sizes = [1, 128], strides = [1, 1]} : vector<8x128xf32> to vector<1x128xf32>
    %294 = vector.extract_strided_slice %228 {offsets = [4, 0], sizes = [1, 128], strides = [1, 1]} : vector<8x128xf32> to vector<1x128xf32>
    %295 = vector.extract_strided_slice %228 {offsets = [1, 0], sizes = [1, 128], strides = [1, 1]} : vector<8x128xf32> to vector<1x128xf32>
    %296 = vector.extract_strided_slice %287 {offsets = [6, 0], sizes = [1, 128], strides = [1, 1]} : vector<8x128xf32> to vector<1x128xf32>
    %297 = vector.extract_strided_slice %228 {offsets = [0, 0], sizes = [1, 128], strides = [1, 1]} : vector<8x128xf32> to vector<1x128xf32>
    %298 = vector.extract_strided_slice %287 {offsets = [7, 0], sizes = [1, 128], strides = [1, 1]} : vector<8x128xf32> to vector<1x128xf32>
    %299 = vector.extract_strided_slice %287 {offsets = [1, 0], sizes = [1, 128], strides = [1, 1]} : vector<8x128xf32> to vector<1x128xf32>
    %300 = vector.extract_strided_slice %287 {offsets = [0, 0], sizes = [1, 128], strides = [1, 1]} : vector<8x128xf32> to vector<1x128xf32>
    %301 = vector.extract_strided_slice %287 {offsets = [4, 0], sizes = [1, 128], strides = [1, 1]} : vector<8x128xf32> to vector<1x128xf32>
    %302 = vector.extract_strided_slice %287 {offsets = [3, 0], sizes = [1, 128], strides = [1, 1]} : vector<8x128xf32> to vector<1x128xf32>
    %303 = vector.extract_strided_slice %228 {offsets = [5, 0], sizes = [1, 128], strides = [1, 1]} : vector<8x128xf32> to vector<1x128xf32>
    %304 = tpu.concatenate %288, %289, %290, %291, %292, %293, %294, %295 in 0 : vector<1x128xf32>, vector<1x128xf32>, vector<1x128xf32>, vector<1x128xf32>, vector<1x128xf32>, vector<1x128xf32>, vector<1x128xf32>, vector<1x128xf32> -> vector<8x128xf32>
    %305 = tpu.concatenate %296, %297, %298, %299, %300, %301, %302, %303 in 0 : vector<1x128xf32>, vector<1x128xf32>, vector<1x128xf32>, vector<1x128xf32>, vector<1x128xf32>, vector<1x128xf32>, vector<1x128xf32>, vector<1x128xf32> -> vector<8x128xf32>
    %306 = tpu.concatenate %304, %305 in 0 : vector<8x128xf32>, vector<8x128xf32> -> vector<16x128xf32>
    %c0_124 = arith.constant 0 : index
    %c0_125 = arith.constant 0 : index
    %307 = vector.load %arg10[%c0_124, %c0_125] : memref<16x128xf32, #tpu.memory_space<vmem>>, vector<16x128xf32>
    tpu.vector_store %arg10[%c0_124, %c0_125], %306 {strides = array<i32>} : memref<16x128xf32, #tpu.memory_space<vmem>>, vector<16x128xf32>,
    return
  }
  func.func @transform_0(%arg0: i32) -> (i32, i32) {
    %c0_i32 = arith.constant 0 : i32
    %c0_i32_0 = arith.constant 0 : i32
    return %c0_i32, %arg0 : i32, i32
  }
  func.func @transform_1(%arg0: i32) -> (i32, i32, i32) {
    %c0_i32 = arith.constant 0 : i32
    %c0_i32_0 = arith.constant 0 : i32
    %c0_i32_1 = arith.constant 0 : i32
    %c0_i32_2 = arith.constant 0 : i32
    return %c0_i32, %c0_i32_0, %c0_i32_1 : i32, i32, i32
  }
  func.func @transform_2(%arg0: i32) -> (i32, i32, i32) {
    %c0_i32 = arith.constant 0 : i32
    %c0_i32_0 = arith.constant 0 : i32
    %c0_i32_1 = arith.constant 0 : i32
    %c0_i32_2 = arith.constant 0 : i32
    return %c0_i32, %c0_i32_0, %c0_i32_1 : i32, i32, i32
  }
  func.func @transform_3(%arg0: i32) -> (i32, i32, i32) {
    %c0_i32 = arith.constant 0 : i32
    %c0_i32_0 = arith.constant 0 : i32
    %c0_i32_1 = arith.constant 0 : i32
    %c0_i32_2 = arith.constant 0 : i32
    return %c0_i32, %c0_i32_0, %c0_i32_1 : i32, i32, i32
  }
  func.func @transform_4(%arg0: i32) -> (i32, i32, i32) {
    %c0_i32 = arith.constant 0 : i32
    %c0_i32_0 = arith.constant 0 : i32
    %c0_i32_1 = arith.constant 0 : i32
    %c0_i32_2 = arith.constant 0 : i32
    return %c0_i32, %c0_i32_0, %c0_i32_1 : i32, i32, i32
  }
  func.func @transform_5(%arg0: i32) -> (i32, i32, i32) {
    %c0_i32 = arith.constant 0 : i32
    %c0_i32_0 = arith.constant 0 : i32
    %c0_i32_1 = arith.constant 0 : i32
    %c0_i32_2 = arith.constant 0 : i32
    return %c0_i32, %c0_i32_0, %c0_i32_1 : i32, i32, i32
  }
  func.func @transform_6(%arg0: i32) -> (i32, i32, i32) {
    %c0_i32 = arith.constant 0 : i32
    %c0_i32_0 = arith.constant 0 : i32
    %c0_i32_1 = arith.constant 0 : i32
    %c0_i32_2 = arith.constant 0 : i32
    return %c0_i32, %c0_i32_0, %c0_i32_1 : i32, i32, i32
  }
  func.func @transform_7(%arg0: i32) -> (i32, i32, i32) {
    %c0_i32 = arith.constant 0 : i32
    %c0_i32_0 = arith.constant 0 : i32
    %c0_i32_1 = arith.constant 0 : i32
    %c0_i32_2 = arith.constant 0 : i32
    return %c0_i32, %c0_i32_0, %c0_i32_1 : i32, i32, i32
  }
  func.func @transform_8(%arg0: i32) -> (i32, i32, i32) {
    %c0_i32 = arith.constant 0 : i32
    %c0_i32_0 = arith.constant 0 : i32
    %c0_i32_1 = arith.constant 0 : i32
    %c0_i32_2 = arith.constant 0 : i32
    return %c0_i32, %c0_i32_0, %c0_i32_1 : i32, i32, i32
  }
  func.func @transform_9(%arg0: i32) -> (i32, i32) {
    %c0_i32 = arith.constant 0 : i32
    %c0_i32_0 = arith.constant 0 : i32
    return %c0_i32, %arg0 : i32, i32
  }
}

</mosaic_0001>

<bundles_post_ra>
// kernel: tpu_custom_call.1
= control target key start
LH: loop header
LB: loop body
LE: loop exit
PB: predicated region body
PF: predicated region fallthrough
CT: control target
= control target key end

     0   :  { %14 = vsyncpa [#allocation4], 0  ;;  %s2048_s0 = inlined_call_operand.vmem [shape: f32[16,256], index: 0, kind: input, shape index: {}]   ;;  %s2049_s1 = inlined_call_operand.vmem [shape: bf16[2,32,8], index: 1, kind: input, shape index: {}]   ;;  %s2050_s2 = inlined_call_operand.vmem [shape: f32[2,32,1], index: 2, kind: input, shape index: {}]   ;;  %s2051_s3 = inlined_call_operand.vmem [shape: bf16[2,16,32], index: 3, kind: input, shape index: {}]   ;;  %s2052_s4 = inlined_call_operand.vmem [shape: f32[2,16,1], index: 4, kind: input, shape index: {}]   ;;  %s2053_s5 = inlined_call_operand.vmem [shape: bf16[2,32,8], index: 5, kind: input, shape index: {}]   ;;  %s2054_s6 = inlined_call_operand.vmem [shape: f32[2,32,1], index: 6, kind: input, shape index: {}]   ;;  %s2055_s7 = inlined_call_operand.vmem [shape: bf16[2,16,32], index: 7, kind: input, shape index: {}]   ;;  %s2056_s8 = inlined_call_operand.vmem [shape: f32[2,16,1], index: 8, kind: input, shape index: {}]   ;;  %s2057_s9 = inlined_call_operand.hbm [shape: f32[16,256], index: 9, kind: output, shape index: {}]  }
   0x1   :  { %16 = vsyncpa [#allocation4 + $0x1], 0  ;;  %s1696_s30 = smov 0   ;;  %s1698_s10 = smov 0  }
   0x2   :  { %s1700_s11 = smov 0   ;;  %s1702_s12 = smov 0  }
   0x3 LB: > { %s1339_s13 = sadd.s32 4294967295, %s1635_s12   ;;  %s1340_s14 = sadd.s32 4294967294, %s1635_s12   ;;  %s1635_s12 = sphi %s1702_s12, %s2065_s12   ;;  %s1631_s11 = sphi %s1700_s11, %s2064_s11   ;;  %s1627_s10 = sphi %s1698_s10, %s2063_s10   ;;  %s1623_s30 = sphi %s1696_s30, %s2062_s30  }
   0x4   : > { %s1719_s15 = sadd.s32 1, %s1635_s12   ;;  %s29_s16 = sadd.s32 1, %s1631_s11 }
   0x5   : > { %s26_s17 = ssub.s32 %s1635_s12, %s1719_s15  ;;  %p36_p0 = scmp.ne.s32.totalorder %s1631_s11, %s1627_s10 }
   0x6   : > { %p27_p1 = scmp.eq.s32.totalorder %s26_s17, 0  ;;  %p37_p2 = scmp.eq.s32.totalorder %s1635_s12, 0 }
   0x7   : > { %p234_p3 = scmp.eq.s32.totalorder %s1339_s13, 1  ;;  %p239_p4 = scmp.ne.s32.totalorder %s1627_s10, %s1623_s30 }
   0x8   : > { %s1732_s18 = scalar_select %p27_p1, %s1631_s11, %s29_s16  }
   0x9   : > { %p38_p5 = por %p37_p2, %p36_p0  ;;  %p1734_p6 = por %p234_p3, %p36_p0 }
   0xa   : > { %p240_p7 = scmp.eq.s32.totalorder %s1340_s14, 1  ;;  %p1342_p9 = scmp.ge.s32.totalorder %s1635_s12, 2 }
   0xc   : > { %p1738_p8 = por %p240_p7, %p239_p4  ;;  %280 = sbr.rel (%p1342_p9) target bundleno = 26 (0x1a), region = 48 }
  0x13   : > { %283 = sbr.rel (!%p38_p5) target bundleno = 26 (0x1a), region = 52  ;;  %s285_s21 = sand.u32 (%p38_p5), 1, %s1631_s11  }
  0x14   : > { %s1344_s22 = sshll.u32 (%p38_p5), %s1635_s12, 3  ;;  %s1343_s23 = sshll.u32 (%p38_p5), %s285_s21, 4 }
  0x15   : > { %s289_s26 = scalar_lea.vmem (%p38_p5), %s2048_s0, %s1344_s22  ;;  %s287_s27 = scalar_lea.vmem (%p38_p5), [#allocation2], %s1343_s23 }
  0x16   : > { %v319_v0 = vld [vmem:[%s289_s26] sm:$0xff] (%p38_p5)  ;;  %v321_v1 = vld [vmem:[%s289_s26 + $0x10] sm:$0xff] (%p38_p5) }
  0x17   : > { %320 = vst [vmem:[%s287_s27] sm:$0xff] (%p38_p5), %v319_v0  ;;  %322 = vst [vmem:[%s287_s27 + $0x8] sm:$0xff] (%p38_p5), %v321_v1 }
  0x1a PF: > { %p1345_p10 = scmp.ge.s32.totalorder %s1635_s12, 1  ;;  %p327_p11 = scmp.lt.s32.totalorder %s1635_s12, 3 }
  0x1c   : > { %p328_p12 = pnand %p1345_p10, %p327_p11 }
  0x1d   : > { %s2058_s28 = sand.u32 (!%p328_p12), 1, %s1627_s10   ;;  %v1545_v2 = vld [vmem:[%s2049_s1] sm:$0xff] (!%p328_p12)   ;;  %vm427_vm0 = vcmask (!%p328_p12), 64512   ;;  %vm434_vm1 = vcmask (!%p328_p12), 1043456   ;;  %v1637_v4 = vmov (!%p328_p12), 0   ;;  %v378_v7 = vld [vmem:[%s2050_s2 + $0x10] sm:$0xff] (!%p328_p12) }
  0x1e   : > { %331 = sbr.rel (%p328_p12) target bundleno = 2103 (0x837), region = 90  ;;  %s1755_s29 = sshll.u32 (!%p328_p12), %s2058_s28, 4  ;;  %1438 = vmatprep.mubr.msk.bf16.mxu0 (!%p328_p12), %vm427_vm0, %v1545_v2  ;;  %1543 = vset.pattern.permute.xlu0 (!%p328_p12), %v1637_v4  ;;  %v376_v5 = vld [vmem:[%s2050_s2] sm:$0xff] (!%p328_p12)  ;;  %v377_v8 = vld [vmem:[%s2050_s2 + $0x8] sm:$0xff] (!%p328_p12)  ;;  %v379_v11 = vld [vmem:[%s2050_s2 + $0x18] sm:$0xff] (!%p328_p12)  ;;  %v1638_v32 = vmov (!%p328_p12), 0.0  }
  0x1f   : > { %s336_s17 = scalar_lea.vmem (!%p328_p12), [#allocation2], %s1755_s29  ;;  %399 = vperm.xlu0 (!%p328_p12), %1543, %v376_v5   ;;  %1544 = vset.pattern.permute.xlu1 (!%p328_p12), %v1637_v4  ;;  %v1546_v10 = vld [vmem:[%s2049_s1 + $0x8] sm:$0xff] (!%p328_p12)   ;;  %v382_v12 = vld [vmem:[%s2052_s4] sm:$0xff] (!%p328_p12)  ;;  %v390_v16 = vld [vmem:[%s2054_s6 + $0x10] sm:$0xff] (!%p328_p12)  ;;  %vm1639_vm2 = vmmov (!%p328_p12), 0   ;;  %vm508_vm3 = vcmask (!%p328_p12), 261120  }
  0x20   : > { %v1763_v3 = vld [vmem:[%s336_s17 + $0x8] sm:$0xff] (!%p328_p12)  ;;  %409 = vperm.xlu1 (!%p328_p12), %1544, %v378_v7   ;;  %v388_v14 = vld [vmem:[%s2054_s6] sm:$0xff] (!%p328_p12)  ;;  %v1372_v22 = vld [vmem:[%s2050_s2 + $0x30] sm:$0xff] (!%p328_p12)  ;;  %1442 = vmatprep.subr.bf16.mxu1 (!%p328_p12), %v1638_v32  ;;  %vm1640_vm6 = vmmov (!%p328_p12), 1   ;;  %vm789_vm15 = vcmask (!%p328_p12), 1040384   ;;  %s368_s16 = scalar_lea.vmem (!%p328_p12), [#allocation3], %s1755_s29 }
  0x21   : > { %v396_v6 = vpack.c.bf16 (!%p328_p12), %v1763_v3, %v1763_v3  ;;  %v383_v13 = vld [vmem:[%s2052_s4 + $0x8] sm:$0xff] (!%p328_p12)  ;;  %v391_v17 = vld [vmem:[%s2054_s6 + $0x18] sm:$0xff] (!%p328_p12)  ;;  %v394_v18 = vld [vmem:[%s2056_s8] sm:$0xff] (!%p328_p12)  ;;  %1446 = vmatprep.mubr.msk.bf16.mxu1 (!%p328_p12), %vm1639_vm2, %v1638_v32  ;;  %s1272_s21 = sshll.u32 (!%p328_p12), %s368_s16, 4  ;;  %s1409_s22 = sshll.u32 (!%p328_p12), %s1339_s13, 7  ;;  %s1988_s21 = int_to_ptr.vmem [resolvable:$true] %s1272_s21 }
  0x22   : > { %v389_v15 = vld [vmem:[%s2054_s6 + $0x8] sm:$0xff] (!%p328_p12)  ;;  %v1370_v20 = vld [vmem:[%s2050_s2 + $0x20] sm:$0xff] (!%p328_p12)  ;;  %v1373_v23 = vld [vmem:[%s2050_s2 + $0x38] sm:$0xff] (!%p328_p12)  ;;  %s1998_s23 = scalar_lea.hbm (!%p328_p12), %s2057_s9, %s1409_s22  ;;  %s2061_s24 = sand.u32 (!%p328_p12), 1, %s1627_s10  }
  0x23   : > { %1492 = vmatprep.subr.msk.bf16.mxu0 (!%p328_p12), %vm434_vm1, %v396_v6  ;;  %v436_v9 = vsel (!%p328_p12), %vm434_vm1, %v396_v6, 0  ;;  %404 = vperm.xlu0 (!%p328_p12), %1543, %v377_v8   ;;  %v395_v19 = vld [vmem:[%s2056_s8 + $0x8] sm:$0xff] (!%p328_p12)  ;;  %v1376_v24 = vld [vmem:[%s2052_s4 + $0x10] sm:$0xff] (!%p328_p12)  ;;  %v1377_v25 = vld [vmem:[%s2052_s4 + $0x18] sm:$0xff] (!%p328_p12)  ;;  %s2006_s25 = scalar_lea.sflag (!%p328_p12), [#allocation4], %s2061_s24  ;;  %s1573_s26 = scalar_lea.vmem (!%p328_p12), %s1988_s21, 256 }
  0x24   : > { %1437 = vmatpush3.bf16.msra.mxu0 (!%p328_p12), %v436_v9  ;;  %414 = vperm.xlu1 (!%p328_p12), %1544, %v379_v11   ;;  %v1371_v21 = vld [vmem:[%s2050_s2 + $0x28] sm:$0xff] (!%p328_p12)  ;;  %v1382_v26 = vld [vmem:[%s2054_s6 + $0x20] sm:$0xff] (!%p328_p12)  ;;  %v1384_v28 = vld [vmem:[%s2054_s6 + $0x30] sm:$0xff] (!%p328_p12)  ;;  %p1574_p13 = scmp.ne.s32.totalorder (!%p328_p12), %s1988_s21, %s1573_s26  ;;  %s1642_s27 = smov (!%p328_p12), [#allocation3]  }
  0x25   : > { %v1383_v27 = vld [vmem:[%s2054_s6 + $0x28] sm:$0xff]  ;;  %v1385_v29 = vld [vmem:[%s2054_s6 + $0x38] sm:$0xff]  ;;  %v1388_v30 = vld [vmem:[%s2056_s8 + $0x10] sm:$0xff] }
  0x26   : > { %v1389_v31 = vld [vmem:[%s2056_s8 + $0x18] sm:$0xff]  ;;  %v1547_v51 = vld [vmem:[%s2051_s3] sm:$0xff]   ;;  %p1575_p0 = pnand %p1574_p13, %p1734_p6 }
  0x27   : > { %1439 = vmatmul.mubr.msk.bf16.vlgmr.msra.gmra.mrb[0].mxu0 %vm427_vm0, %v1546_v10  ;;  %495 = vperm.xlu0 %1543, %v382_v12   ;;  %v1548_v52 = vld [vmem:[%s2053_s5] sm:$0xff]  }
  0x28   : > { %500 = vperm.xlu1 %1544, %v383_v13   ;;  %1452 = vmatprep.mubr.msk.bf16.mxu0 %vm427_vm0, %v1548_v52  ;;  %p1576_p1 = pneg %p1575_p0 }
  0x2b   : > { %589 = vperm.xlu0 %1543, %v388_v14  }
  0x2c   : > { %594 = vperm.xlu1 %1544, %v389_v15  }
  0x2f   : > { %599 = vperm.xlu0 %1543, %v390_v16  }
  0x30   : > { %604 = vperm.xlu1 %1544, %v391_v17  }
  0x33   : > { %683 = vperm.xlu0 %1543, %v394_v18   ;;  %v1641_v18 = vmov -1.272  }
  0x34   : > { %688 = vperm.xlu1 %1544, %v395_v19  }
  0x37   : > { %852 = vperm.xlu0 %1543, %v1370_v20  }
  0x38   : > { %857 = vperm.xlu1 %1544, %v1371_v21  }
  0x3b   : > { %862 = vperm.xlu0 %1543, %v1372_v22   ;;  %v370_v22 = vld [vmem:[%s336_s17] sm:$0xff]  ;;  %s1577_s17 = sshll.u32 %s1642_s27, 4  ;;  %s1578_s17 = int_to_ptr.vmem [resolvable:$false] %s1577_s17 }
  0x3c   : > { %867 = vperm.xlu1 %1544, %v1373_v23   ;;  %s1579_s28 = scalar_lea.vmem %s1578_s17, 512  ;;  %p1580_p2 = scmp.lt.s32.totalorder %s1988_s21, %s1578_s17 }
  0x3d   : > { %p1581_p3 = scmp.lt.s32.totalorder %s1579_s28, %s1573_s26 }
  0x3f   : > { %946 = vperm.xlu0 %1543, %v1376_v24   ;;  %p1582_p4 = por %p1581_p3, %p1580_p2 }
  0x40   : > { %951 = vperm.xlu1 %1544, %v1377_v25  }
  0x41   : > { %p1583_p5 = pnand %p1582_p4, %p1576_p1 }
  0x43   : > { %1039 = vperm.xlu0 %1543, %v1382_v26  }
  0x44   : > { %1044 = vperm.xlu1 %1544, %v1383_v27  }
  0x47   : > { %1049 = vperm.xlu0 %1543, %v1384_v28  }
  0x48   : > { %1054 = vperm.xlu1 %1544, %v1385_v29  }
  0x4b   : > { %1133 = vperm.xlu0 %1543, %v1388_v30   ;;  %v1549_v30 = vld [vmem:[%s2053_s5 + $0x8] sm:$0xff]  }
  0x4c   : > { %1138 = vperm.xlu1 %1544, %v1389_v31  }
  0x9e   : > { %v400_v34 = vpop.permute.xlu0 %399 }
  0x9f   : > { %v410_v33 = vpop.permute.xlu1 %409 }
  0xa2   : > { %v405_v41 = vpop.permute.xlu0 %404 }
  0xa3   : > { %v415_v38 = vpop.permute.xlu1 %414 }
  0xa6   : > { %v496_v53 = vpop.permute.xlu0 %495 }
  0xa7   : > { %v501_v24 = vpop.permute.xlu1 %500 }
  0xaa   : > { %v590_v31 = vpop.permute.xlu0 %589 }
  0xfa   : > { %v1440_v35 = vpop.f32.mrb[0].mxu0 }
  0xfb   : > { %v481_v36 = vadd.f32 %v1440_v35, %v410_v33  ;;  %v472_v37 = vpop.f32.mrb[1].mxu0  ;;  %v595_v33 = vpop.permute.xlu1 %594 }
  0xfc   : > { %v473_v39 = vadd.f32 %v472_v37, %v400_v34  ;;  %v1441_v40 = vpop.f32.mrb[2].mxu0  ;;  %v600_v34 = vpop.permute.xlu0 %599 }
  0xfd   : > { %v484_v42 = vadd.f32 %v1441_v40, %v415_v38  ;;  %v475_v43 = vpop.f32.mrb[3].mxu0  ;;  %v489_v45 = vmax.f32 %v481_v36, 0.0 }
  0xfe   : > { %v476_v44 = vadd.f32 %v475_v43, %v405_v41  ;;  %v487_v47 = vmax.f32 %v473_v39, 0.0 }
  0xff   : > { %v490_v46 = vmax.f32 %v484_v42, 0.0  ;;  %v605_v38 = vpop.permute.xlu1 %604 }
 0x100   : > { %v488_v48 = vmax.f32 %v476_v44, 0.0  ;;  %v684_v52 = vpop.permute.xlu0 %683 }
 0x101   : > { %v492_v49 = vpack.c.bf16 %v490_v46, %v489_v45 }
 0x102   : > { %v491_v50 = vpack.c.bf16 %v488_v48, %v487_v47 }
 0x104   : > { %1443 = vmatpush3.bf16.msra.mxu1 %v491_v50  ;;  %v1550_v50 = vld [vmem:[%s2055_s7] sm:$0xff]  }
 0x105   : > { %1444 = vmatprep.subr.bf16.mxu1 %v1638_v32 }
 0x108   : > { %1445 = vmatpush3.bf16.msra.mxu1 %v492_v49 }
 0x109   : > { %1456 = vmatprep.subr.bf16.mxu1 %v1638_v32 }
 0x10b   : > { %1447 = vmatmul.mubr.msk.bf16.vlgmr.msra.gmra.mrb[0].mxu1 %vm508_vm3, %v1547_v51  ;;  %v1551_v51 = vld [vmem:[%s2049_s1 + $0x10] sm:$0xff]  }
 0x10c   : > { %1460 = vmatprep.mubr.msk.bf16.mxu1 %vm1639_vm2, %v1638_v32 }
 0x1de   : > { %v546_v54 = vpop.f32.mrb[0].mxu1 }
 0x1df   : > { %v547_v55 = vadd.f32 %v546_v54, %v496_v53  ;;  %v1448_v56 = vpop.f32.mrb[1].mxu1 }
 0x1e0   : > { %v549_v57 = vpop.f32.mrb[2].mxu1 }
 0x1e1   : > { %v555_v58 = vand.u32 2147483647, %v547_v55  ;;  %v1449_v59 = vpop.f32.mrb[3].mxu1  ;;  %vm553_vm9 = vcmp.ge.f32.partialorder %v547_v55, 0.0  ;;  %v550_v25 = vadd.f32 %v549_v57, %v501_v24 }
 0x1e2   : > { %v554_v19 = vsel %vm553_vm9, 1.272, %v1641_v18  ;;  %vm800_vm9 = vcmask 1046528  }
 0x1e3   : > { %vm556_vm4 = vcmp.gt.f32.partialorder %v555_v58, 2.4142137  ;;  %v560_v60 = vadd.f32 1.0, %v555_v58  ;;  %vm557_vm5 = vcmp.gt.f32.partialorder %v555_v58, 0.41421357  ;;  %v1354_v62 = vadd.f32 -1.0, %v555_v58 }
 0x1e4   : > { %vm558_vm7 = vmxor %vm556_vm4, %vm1640_vm6 }
 0x1e5   : > { %v561_v61 = vsel %vm556_vm4, %v555_v58, %v560_v60  ;;  %vm559_vm8 = vmand %vm557_vm5, %vm558_vm7  ;;  %vm793_vm5 = vcmask 1042432   ;;  %vm796_vm7 = vcmask 1044480  }
 0x1e6   : > { %1557 = vrcp.f32 %v561_v61  ;;  %v568_v13 = vsel %vm559_vm8, 0.7853982, %v1638_v32 }
 0x1e7   : > { %v569_v16 = vsel %vm556_vm4, 1.5707964, %v568_v13 }
 0x1f0   : > { %v1558_v63 = vpop.eup %1557 }
 0x1f1   : > { %v563_v0 = vsub.f32 0.0, %v1558_v63  ;;  %v565_v1 = vmul.f32 %v1558_v63, %v1354_v62 }
 0x1f3   : > { %v566_v2 = vsel %vm559_vm8, %v565_v1, %v555_v58  ;;  %vm798_vm8 = vcmask 1045504  }
 0x1f4   : > { %v567_v4 = vsel %vm556_vm4, %v563_v0, %v566_v2  ;;  %vm791_vm4 = vcmask 1041408  }
 0x1f5   : > { %v570_v5 = vmul.f32 %v567_v4, %v567_v4 }
 0x1f7   : > { %v571_v6 = vmul.f32 0.080537446, %v570_v5 }
 0x1f9   : > { %v1355_v7 = vadd.f32 -0.13877685, %v571_v6 }
 0x1fb   : > { %v573_v8 = vmul.f32 %v1355_v7, %v570_v5 }
 0x1fd   : > { %v574_v9 = vadd.f32 0.19977711, %v573_v8 }
 0x1ff   : > { %v575_v10 = vmul.f32 %v574_v9, %v570_v5 }
 0x201   : > { %v1356_v11 = vadd.f32 -0.3333295, %v575_v10 }
 0x203   : > { %v577_v12 = vmul.f32 %v1356_v11, %v570_v5 }
 0x205   : > { %v578_v14 = vmul.f32 %v577_v12, %v567_v4 }
 0x207   : > { %v579_v15 = vadd.f32 %v578_v14, %v567_v4 }
 0x209   : > { %v580_v17 = vadd.f32 %v579_v15, %v569_v16 }
 0x20b   : > { %v581_v20 = vmul.f32 %v580_v17, %v554_v19 }
 0x20d   : > { %v582_v21 = vmul.f32 1.442695, %v581_v20 }
 0x20f   : > { %1559 = vpow2.f32 %v582_v21 }
 0x219   : > { %v1560_v23 = vpop.eup %1559 }
 0x21a   : > { %v584_v26 = vmul.f32 %v1560_v23, %v370_v22  ;;  %v689_v22 = vpop.permute.xlu1 %688 }
 0x21c   : > { %v1870_v27 = vadd.f32 %v584_v26, %v550_v25 }
 0x21e   : > { %v586_v28 = vpack.c.bf16 %v1870_v27, %v1870_v27  ;;  %v774_v25 = vrot.slane %v1870_v27, 1  ;;  %v776_v26 = vrot.slane %v1870_v27, 5 }
 0x220   : > { %1493 = vmatprep.subr.msk.bf16.mxu0 %vm434_vm1, %v586_v28  ;;  %v624_v29 = vsel %vm434_vm1, %v586_v28, 0 }
 0x221   : > { %1451 = vmatpush3.bf16.msra.mxu0 %v624_v29  ;;  %v804_v29 = vrot.slane %v1870_v27, 6 }
 0x224   : > { %1453 = vmatmul.mubr.msk.bf16.vlgmr.msra.gmra.mrb[4].mxu0 %vm427_vm0, %v1549_v30 }
 0x225   : > { %1466 = vmatprep.mubr.msk.bf16.mxu0 %vm427_vm0, %v1551_v51 }
 0x2f7   : > { %v1454_v35 = vpop.f32.mrb[4].mxu0 }
 0x2f8   : > { %v669_v36 = vadd.f32 %v1454_v35, %v600_v34  ;;  %v660_v37 = vpop.f32.mrb[5].mxu0  ;;  %v783_v34 = vrot.slane %v1870_v27, 7  ;;  %v790_v35 = vsel %vm789_vm15, %v774_v25, %v776_v26 }
 0x2f9   : > { %v661_v39 = vadd.f32 %v660_v37, %v590_v31  ;;  %v1455_v40 = vpop.f32.mrb[6].mxu0 }
 0x2fa   : > { %v672_v41 = vadd.f32 %v1455_v40, %v605_v38  ;;  %v663_v42 = vpop.f32.mrb[7].mxu0  ;;  %v677_v44 = vmax.f32 %v669_v36, 0.0  ;;  %v808_v38 = vrot.slane %v1870_v27, 3 }
 0x2fb   : > { %v664_v43 = vadd.f32 %v663_v42, %v595_v33  ;;  %v675_v46 = vmax.f32 %v661_v39, 0.0  ;;  %v785_v42 = vrot.slane %v1870_v27, 4 }
 0x2fc   : > { %v678_v45 = vmax.f32 %v672_v41, 0.0 }
 0x2fd   : > { %v676_v47 = vmax.f32 %v664_v43, 0.0 }
 0x2fe   : > { %v680_v48 = vpack.c.bf16 %v678_v45, %v677_v44 }
 0x2ff   : > { %v679_v49 = vpack.c.bf16 %v676_v47, %v675_v46 }
 0x301   : > { %1457 = vmatpush3.bf16.msra.mxu1 %v679_v49 }
 0x302   : > { %1458 = vmatprep.subr.bf16.mxu1 %v1638_v32 }
 0x305   : > { %1459 = vmatpush3.bf16.msra.mxu1 %v680_v48 }
 0x306   : > { %1470 = vmatprep.subr.bf16.mxu1 %v1638_v32 }
 0x308   : > { %1461 = vmatmul.mubr.msk.bf16.vlgmr.msra.gmra.mrb[4].mxu1 %vm508_vm3, %v1550_v50 }
 0x309   : > { %1474 = vmatprep.mubr.msk.bf16.mxu1 %vm1639_vm2, %v1638_v32 }
 0x3db   : > { %v733_v53 = vpop.f32.mrb[4].mxu1 }
 0x3dc   : > { %v734_v54 = vadd.f32 %v733_v53, %v684_v52  ;;  %v1462_v55 = vpop.f32.mrb[5].mxu1  ;;  %v1552_v53 = vld [vmem:[%s2049_s1 + $0x18] sm:$0xff]  }
 0x3dd   : > { %v736_v56 = vpop.f32.mrb[6].mxu1  ;;  %v858_v55 = vpop.permute.xlu1 %857 }
 0x3de   : > { %v742_v57 = vand.u32 2147483647, %v734_v54  ;;  %v1463_v58 = vpop.f32.mrb[7].mxu1  ;;  %vm740_vm14 = vcmp.ge.f32.partialorder %v734_v54, 0.0  ;;  %v737_v23 = vadd.f32 %v736_v56, %v689_v22  ;;  %v853_v54 = vpop.permute.xlu0 %852 }
 0x3df   : > { %v741_v17 = vsel %vm740_vm14, 1.272, %v1641_v18 }
 0x3e0   : > { %vm743_vm10 = vcmp.gt.f32.partialorder %v742_v57, 2.4142137  ;;  %v747_v59 = vadd.f32 1.0, %v742_v57  ;;  %vm744_vm11 = vcmp.gt.f32.partialorder %v742_v57, 0.41421357  ;;  %v1363_v61 = vadd.f32 -1.0, %v742_v57 }
 0x3e1   : > { %vm745_vm12 = vmxor %vm743_vm10, %vm1640_vm6 }
 0x3e2   : > { %v748_v60 = vsel %vm743_vm10, %v742_v57, %v747_v59  ;;  %vm746_vm13 = vmand %vm744_vm11, %vm745_vm12  ;;  %v863_v56 = vpop.permute.xlu0 %862 }
 0x3e3   : > { %1561 = vrcp.f32 %v748_v60  ;;  %v755_v12 = vsel %vm746_vm13, 0.7853982, %v1638_v32  ;;  %v868_v60 = vpop.permute.xlu1 %867 }
 0x3e4   : > { %v756_v15 = vsel %vm743_vm10, 1.5707964, %v755_v12 }
 0x3ed   : > { %v1562_v62 = vpop.eup %1561 }
 0x3ee   : > { %v750_v63 = vsub.f32 0.0, %v1562_v62  ;;  %v752_v0 = vmul.f32 %v1562_v62, %v1363_v61 }
 0x3f0   : > { %v753_v1 = vsel %vm746_vm13, %v752_v0, %v742_v57 }
 0x3f1   : > { %v754_v2 = vsel %vm743_vm10, %v750_v63, %v753_v1 }
 0x3f2   : > { %v757_v4 = vmul.f32 %v754_v2, %v754_v2 }
 0x3f4   : > { %v758_v5 = vmul.f32 0.080537446, %v757_v4 }
 0x3f6   : > { %v1364_v6 = vadd.f32 -0.13877685, %v758_v5 }
 0x3f8   : > { %v760_v7 = vmul.f32 %v1364_v6, %v757_v4 }
 0x3fa   : > { %v761_v8 = vadd.f32 0.19977711, %v760_v7 }
 0x3fc   : > { %v762_v9 = vmul.f32 %v761_v8, %v757_v4 }
 0x3fe   : > { %v1365_v10 = vadd.f32 -0.3333295, %v762_v9  ;;  %v1553_v9 = vld [vmem:[%s2051_s3 + $0x8] sm:$0xff]  }
 0x400   : > { %v764_v11 = vmul.f32 %v1365_v10, %v757_v4  ;;  %v1554_v10 = vld [vmem:[%s2053_s5 + $0x10] sm:$0xff]  }
 0x402   : > { %v765_v13 = vmul.f32 %v764_v11, %v754_v2  ;;  %v947_v11 = vpop.permute.xlu0 %946 }
 0x404   : > { %v766_v14 = vadd.f32 %v765_v13, %v754_v2 }
 0x406   : > { %v767_v16 = vadd.f32 %v766_v14, %v756_v15 }
 0x408   : > { %v768_v19 = vmul.f32 %v767_v16, %v741_v17 }
 0x40a   : > { %v769_v20 = vmul.f32 1.442695, %v768_v19 }
 0x40c   : > { %1563 = vpow2.f32 %v769_v20 }
 0x416   : > { %v1564_v21 = vpop.eup %1563 }
 0x417   : > { %v771_v24 = vmul.f32 %v1564_v21, %v1763_v3 }
 0x419   : > { %v772_v28 = vadd.f32 %v771_v24, %v737_v23 }
 0x41b   : > { %v802_v30 = vrot.slane %v772_v28, 2  ;;  %v806_v31 = vrot.slane %v772_v28, 5  ;;  %v779_v33 = vrot.slane %v772_v28, 6  ;;  %v781_v36 = vrot.slane %v772_v28, 1 }
 0x41c   : > { %v787_v45 = vrot.slane %v772_v28, 7 }
 0x41d   : > { %v810_v3 = vsel %vm789_vm15, %v802_v30, %v804_v29  ;;  %v792_v37 = vsel %vm791_vm4, %v790_v35, %v779_v33 }
 0x41e   : > { %v811_v39 = vsel %vm791_vm4, %v810_v3, %v806_v31  ;;  %v794_v40 = vsel %vm793_vm5, %v792_v37, %v779_v33 }
 0x41f   : > { %v812_v41 = vsel %vm793_vm5, %v811_v39, %v772_v28  ;;  %v795_v43 = vsel %vm434_vm1, %v794_v40, %v781_v36 }
 0x420   : > { %v813_v44 = vsel %vm434_vm1, %v812_v41, %v783_v34  ;;  %v797_v46 = vsel %vm796_vm7, %v795_v43, %v783_v34 }
 0x421   : > { %v814_v47 = vsel %vm796_vm7, %v813_v44, %v808_v38  ;;  %v799_v48 = vsel %vm798_vm8, %v797_v46, %v785_v42 }
 0x422   : > { %v815_v49 = vsel %vm798_vm8, %v814_v47, %v783_v34  ;;  %v1919_v50 = vsel %vm800_vm9, %v799_v48, %v787_v45  ;;  %v952_v45 = vpop.permute.xlu1 %951 }
 0x423   : > { %v1922_v51 = vsel %vm800_vm9, %v815_v49, %v806_v31 }
 0x424   : > { %v849_v27 = vpack.c.bf16 %v1922_v51, %v1922_v51 }
 0x426   : > { %1494 = vmatprep.subr.msk.bf16.mxu0 %vm434_vm1, %v849_v27  ;;  %v887_v52 = vsel %vm434_vm1, %v849_v27, 0 }
 0x427   : > { %1465 = vmatpush3.bf16.msra.mxu0 %v887_v52  ;;  %v1555_v52 = vld [vmem:[%s2053_s5 + $0x18] sm:$0xff]  }
 0x42a   : > { %1467 = vmatmul.mubr.msk.bf16.vlgmr.msra.gmra.mrb[8].mxu0 %vm427_vm0, %v1552_v53  ;;  %v1040_v53 = vpop.permute.xlu0 %1039 }
 0x42b   : > { %1480 = vmatprep.mubr.msk.bf16.mxu0 %vm427_vm0, %v1554_v10 }
 0x4fd   : > { %v1468_v57 = vpop.f32.mrb[8].mxu0 }
 0x4fe   : > { %v932_v58 = vadd.f32 %v1468_v57, %v863_v56  ;;  %v923_v59 = vpop.f32.mrb[9].mxu0 }
 0x4ff   : > { %v924_v61 = vadd.f32 %v923_v59, %v853_v54  ;;  %v1469_v62 = vpop.f32.mrb[10].mxu0  ;;  %v1045_v54 = vpop.permute.xlu1 %1044 }
 0x500   : > { %v935_v63 = vadd.f32 %v1469_v62, %v868_v60  ;;  %v926_v0 = vpop.f32.mrb[11].mxu0  ;;  %v940_v2 = vmax.f32 %v932_v58, 0.0 }
 0x501   : > { %v927_v1 = vadd.f32 %v926_v0, %v858_v55  ;;  %v938_v5 = vmax.f32 %v924_v61, 0.0  ;;  %v1050_v55 = vpop.permute.xlu0 %1049 }
 0x502   : > { %v941_v4 = vmax.f32 %v935_v63, 0.0 }
 0x503   : > { %v939_v6 = vmax.f32 %v927_v1, 0.0  ;;  %v1055_v58 = vpop.permute.xlu1 %1054 }
 0x504   : > { %v943_v7 = vpack.c.bf16 %v941_v4, %v940_v2 }
 0x505   : > { %v942_v8 = vpack.c.bf16 %v939_v6, %v938_v5 }
 0x507   : > { %1471 = vmatpush3.bf16.msra.mxu1 %v942_v8  ;;  %v1134_v8 = vpop.permute.xlu0 %1133 }
 0x508   : > { %1472 = vmatprep.subr.bf16.mxu1 %v1638_v32 }
 0x50b   : > { %1473 = vmatpush3.bf16.msra.mxu1 %v943_v7  ;;  %v1556_v7 = vld [vmem:[%s2055_s7 + $0x8] sm:$0xff]  }
 0x50c   : > { %1484 = vmatprep.subr.bf16.mxu1 %v1638_v32 }
 0x50e   : > { %1475 = vmatmul.mubr.msk.bf16.vlgmr.msra.gmra.mrb[8].mxu1 %vm508_vm3, %v1553_v9 }
 0x50f   : > { %1488 = vmatprep.mubr.msk.bf16.mxu1 %vm1639_vm2, %v1638_v32 }
 0x5e1   : > { %v996_v12 = vpop.f32.mrb[8].mxu1 }
 0x5e2   : > { %v997_v13 = vadd.f32 %v996_v12, %v947_v11  ;;  %v1476_v14 = vpop.f32.mrb[9].mxu1 }
 0x5e3   : > { %v999_v15 = vpop.f32.mrb[10].mxu1 }
 0x5e4   : > { %v1005_v16 = vand.u32 2147483647, %v997_v13  ;;  %v1477_v17 = vpop.f32.mrb[11].mxu1  ;;  %vm1003_vm13 = vcmp.ge.f32.partialorder %v997_v13, 0.0  ;;  %v1000_v46 = vadd.f32 %v999_v15, %v952_v45 }
 0x5e5   : > { %v1004_v41 = vsel %vm1003_vm13, 1.272, %v1641_v18 }
 0x5e6   : > { %vm1006_vm10 = vcmp.gt.f32.partialorder %v1005_v16, 2.4142137  ;;  %v1010_v19 = vadd.f32 1.0, %v1005_v16  ;;  %vm1007_vm11 = vcmp.gt.f32.partialorder %v1005_v16, 0.41421357  ;;  %v1396_v21 = vadd.f32 -1.0, %v1005_v16 }
 0x5e7   : > { %vm1008_vm2 = vmxor %vm1006_vm10, %vm1640_vm6 }
 0x5e8   : > { %v1011_v20 = vsel %vm1006_vm10, %v1005_v16, %v1010_v19  ;;  %vm1009_vm12 = vmand %vm1007_vm11, %vm1008_vm2 }
 0x5e9   : > { %1565 = vrcp.f32 %v1011_v20  ;;  %v1018_v36 = vsel %vm1009_vm12, 0.7853982, %v1638_v32 }
 0x5ea   : > { %v1019_v39 = vsel %vm1006_vm10, 1.5707964, %v1018_v36 }
 0x5f3   : > { %v1566_v22 = vpop.eup %1565 }
 0x5f4   : > { %v1013_v23 = vsub.f32 0.0, %v1566_v22  ;;  %v1015_v24 = vmul.f32 %v1566_v22, %v1396_v21 }
 0x5f6   : > { %v1016_v25 = vsel %vm1009_vm12, %v1015_v24, %v1005_v16 }
 0x5f7   : > { %v1017_v26 = vsel %vm1006_vm10, %v1013_v23, %v1016_v25 }
 0x5f8   : > { %v1020_v28 = vmul.f32 %v1017_v26, %v1017_v26 }
 0x5fa   : > { %v1021_v29 = vmul.f32 0.080537446, %v1020_v28 }
 0x5fc   : > { %v1397_v30 = vadd.f32 -0.13877685, %v1021_v29 }
 0x5fe   : > { %v1023_v31 = vmul.f32 %v1397_v30, %v1020_v28 }
 0x600   : > { %v1024_v33 = vadd.f32 0.19977711, %v1023_v31 }
 0x602   : > { %v1025_v34 = vmul.f32 %v1024_v33, %v1020_v28 }
 0x604   : > { %v1398_v35 = vadd.f32 -0.3333295, %v1025_v34 }
 0x606   : > { %v1027_v3 = vmul.f32 %v1398_v35, %v1020_v28 }
 0x608   : > { %v1028_v37 = vmul.f32 %v1027_v3, %v1017_v26 }
 0x60a   : > { %v1029_v38 = vadd.f32 %v1028_v37, %v1017_v26 }
 0x60c   : > { %v1030_v40 = vadd.f32 %v1029_v38, %v1019_v39 }
 0x60e   : > { %v1031_v42 = vmul.f32 %v1030_v40, %v1004_v41 }
 0x610   : > { %v1032_v43 = vmul.f32 1.442695, %v1031_v42  ;;  %v1139_v42 = vpop.permute.xlu1 %1138 }
 0x612   : > { %1567 = vpow2.f32 %v1032_v43 }
 0x61c   : > { %v1568_v44 = vpop.eup %1567 }
 0x61d   : > { %v1034_v47 = vmul.f32 %v1568_v44, %v1919_v50 }
 0x61f   : > { %v1952_v48 = vadd.f32 %v1034_v47, %v1000_v46 }
 0x621   : > { %v1036_v49 = vpack.c.bf16 %v1952_v48, %v1952_v48  ;;  %v1231_v47 = vrot.slane %v1952_v48, 7 }
 0x623   : > { %1495 = vmatprep.subr.msk.bf16.mxu0 %vm434_vm1, %v1036_v49  ;;  %v1074_v27 = vsel %vm434_vm1, %v1036_v49, 0 }
 0x624   : > { %1479 = vmatpush3.bf16.msra.mxu0 %v1074_v27 }
 0x627   : > { %1481 = vmatmul.mubr.msk.bf16.vlgmr.msra.gmra.mrb[12].mxu0 %vm427_vm0, %v1555_v52  ;;  %v1229_v52 = vrot.slane %v1952_v48, 5 }
 0x6fa   : > { %v1482_v50 = vpop.f32.mrb[12].mxu0 }
 0x6fb   : > { %v1119_v56 = vadd.f32 %v1482_v50, %v1050_v55  ;;  %v1110_v57 = vpop.f32.mrb[13].mxu0 }
 0x6fc   : > { %v1111_v59 = vadd.f32 %v1110_v57, %v1040_v53  ;;  %v1483_v60 = vpop.f32.mrb[14].mxu0 }
 0x6fd   : > { %v1122_v61 = vadd.f32 %v1483_v60, %v1055_v58  ;;  %v1113_v62 = vpop.f32.mrb[15].mxu0  ;;  %v1127_v0 = vmax.f32 %v1119_v56, 0.0  ;;  %v1237_v58 = vrot.slane %v1952_v48, 6 }
 0x6fe   : > { %v1114_v63 = vadd.f32 %v1113_v62, %v1045_v54  ;;  %v1125_v2 = vmax.f32 %v1111_v59, 0.0  ;;  %v1233_v54 = vrot.slane %v1952_v48, 2 }
 0x6ff   : > { %v1128_v1 = vmax.f32 %v1122_v61, 0.0 }
 0x700   : > { %v1126_v4 = vmax.f32 %v1114_v63, 0.0 }
 0x701   : > { %v1130_v5 = vpack.c.bf16 %v1128_v1, %v1127_v0 }
 0x702   : > { %v1129_v6 = vpack.c.bf16 %v1126_v4, %v1125_v2 }
 0x704   : > { %1485 = vmatpush3.bf16.msra.mxu1 %v1129_v6 }
 0x705   : > { %1486 = vmatprep.subr.bf16.mxu1 %v1638_v32 }
 0x708   : > { %1487 = vmatpush3.bf16.msra.mxu1 %v1130_v5 }
 0x70b   : > { %1489 = vmatmul.mubr.msk.bf16.vlgmr.msra.gmra.mrb[12].mxu1 %vm508_vm3, %v1556_v7 }
 0x7de   : > { %v1183_v9 = vpop.f32.mrb[12].mxu1 }
 0x7df   : > { %v1184_v10 = vadd.f32 %v1183_v9, %v1134_v8  ;;  %v1490_v11 = vpop.f32.mrb[13].mxu1 }
 0x7e0   : > { %v1186_v12 = vpop.f32.mrb[14].mxu1 }
 0x7e1   : > { %v1192_v13 = vand.u32 2147483647, %v1184_v10  ;;  %v1491_v14 = vpop.f32.mrb[15].mxu1  ;;  %v1187_v43 = vadd.f32 %v1186_v12, %v1139_v42 }
 0x7e3   : > { %vm1193_vm0 = vcmp.gt.f32.partialorder %v1192_v13, 2.4142137  ;;  %v1197_v15 = vadd.f32 1.0, %v1192_v13  ;;  %vm1194_vm14 = vcmp.gt.f32.partialorder %v1192_v13, 0.41421357  ;;  %v1405_v17 = vadd.f32 -1.0, %v1192_v13 }
 0x7e4   : > { %vm1195_vm10 = vmxor %vm1193_vm0, %vm1640_vm6  ;;  %vm1190_vm6 = vcmp.ge.f32.partialorder %v1184_v10, 0.0 }
 0x7e5   : > { %v1198_v16 = vsel %vm1193_vm0, %v1192_v13, %v1197_v15  ;;  %vm1196_vm3 = vmand %vm1194_vm14, %vm1195_vm10  ;;  %v1191_v38 = vsel %vm1190_vm6, 1.272, %v1641_v18 }
 0x7e6   : > { %1569 = vrcp.f32 %v1198_v16  ;;  %v1205_v34 = vsel %vm1196_vm3, 0.7853982, %v1638_v32  ;;  %v1224_v32 = vrot.slane %v1952_v48, 3 }
 0x7e7   : > { %v1206_v36 = vsel %vm1193_vm0, 1.5707964, %v1205_v34 }
 0x7f0   : > { %v1570_v19 = vpop.eup %1569 }
 0x7f1   : > { %v1200_v20 = vsub.f32 0.0, %v1570_v19  ;;  %v1202_v21 = vmul.f32 %v1570_v19, %v1405_v17 }
 0x7f3   : > { %v1203_v22 = vsel %vm1196_vm3, %v1202_v21, %v1192_v13 }
 0x7f4   : > { %v1204_v23 = vsel %vm1193_vm0, %v1200_v20, %v1203_v22 }
 0x7f5   : > { %v1207_v24 = vmul.f32 %v1204_v23, %v1204_v23 }
 0x7f7   : > { %v1208_v25 = vmul.f32 0.080537446, %v1207_v24 }
 0x7f9   : > { %v1406_v26 = vadd.f32 -0.13877685, %v1208_v25 }
 0x7fb   : > { %v1210_v28 = vmul.f32 %v1406_v26, %v1207_v24 }
 0x7fd   : > { %v1211_v29 = vadd.f32 0.19977711, %v1210_v28 }
 0x7ff   : > { %v1212_v30 = vmul.f32 %v1211_v29, %v1207_v24 }
 0x801   : > { %v1407_v31 = vadd.f32 -0.3333295, %v1212_v30 }
 0x803   : > { %v1214_v33 = vmul.f32 %v1407_v31, %v1207_v24 }
 0x805   : > { %v1215_v35 = vmul.f32 %v1214_v33, %v1204_v23 }
 0x807   : > { %v1216_v3 = vadd.f32 %v1215_v35, %v1204_v23 }
 0x809   : > { %v1217_v37 = vadd.f32 %v1216_v3, %v1206_v36 }
 0x80b   : > { %v1218_v39 = vmul.f32 %v1217_v37, %v1191_v38 }
 0x80d   : > { %v1219_v40 = vmul.f32 1.442695, %v1218_v39 }
 0x80f   : > { %1571 = vpow2.f32 %v1219_v40 }
 0x819   : > { %v1572_v41 = vpop.eup %1571 }
 0x81a   : > { %v1221_v44 = vmul.f32 %v1572_v41, %v1922_v51 }
 0x81c   : > { %v1222_v45 = vadd.f32 %v1221_v44, %v1187_v43 }
 0x81e   : > { %v1227_v46 = vrot.slane %v1222_v45, 4  ;;  %v1235_v49 = vrot.slane %v1222_v45, 5  ;;  %v1246_v27 = vrot.slane %v1222_v45, 6  ;;  %v1248_v56 = vrot.slane %v1222_v45, 7 }
 0x820   : > { %v1239_v18 = vsel %vm789_vm15, %v1224_v32, %v1227_v46  ;;  %v1250_v53 = vsel %vm789_vm15, %v1246_v27, %v1231_v47 }
 0x821   : > { %v1240_v51 = vsel %vm791_vm4, %v1239_v18, %v1229_v52  ;;  %v1251_v55 = vsel %vm791_vm4, %v1250_v53, %v1235_v49 }
 0x822   : > { %v1241_v50 = vsel %vm793_vm5, %v1240_v51, %v1231_v47  ;;  %v1252_v57 = vsel %vm793_vm5, %v1251_v55, %v1246_v27 }
 0x823   : > { %v1242_v59 = vsel %vm434_vm1, %v1241_v50, %v1233_v54  ;;  %v1253_v60 = vsel %vm434_vm1, %v1252_v57, %v1227_v46 }
 0x824   : > { %v1243_v61 = vsel %vm796_vm7, %v1242_v59, %v1235_v49  ;;  %v1254_v62 = vsel %vm796_vm7, %v1253_v60, %v1248_v56 }
 0x825   : > { %v1244_v63 = vsel %vm798_vm8, %v1243_v61, %v1237_v58  ;;  %v1255_v0 = vsel %vm798_vm8, %v1254_v62, %v1235_v49 }
 0x826   : > { %v1245_v48 = vsel %vm800_vm9, %v1244_v63, %v1233_v54  ;;  %v1256_v1 = vsel %vm800_vm9, %v1255_v0, %v1237_v58 }
 0x827   : > { %1257 = vst [vmem:[%s368_s16] sm:$0xff] %v1245_v48  ;;  %1258 = vst [vmem:[%s368_s16 + $0x8] sm:$0xff] %v1256_v1 }
 0x828   : > { %1586 = shalt.err (!%p1583_p5)
}
 0x829   : > { %s1587_s14 = scalar_lea.hbm %s1998_s23, 256  ;;  %s1591_s13 = scalar_lea.hbm %s2057_s9, 512 }
 0x82a   : > { %p1588_p7 = scmp.ne.s32.totalorder %s1998_s23, %s1587_s14  ;;  %p1592_p12 = scmp.lt.u32.totalorder %s1998_s23, %s2057_s9 }
 0x82b   : > { %p1593_p13 = scmp.lt.u32.totalorder %s1591_s13, %s1587_s14  ;;  %p1595_p1 = scmp.lt.u32.totalorder %s1587_s14, %s1998_s23 }
 0x82c   : > { %p1589_p10 = pnand %p1588_p7, %p1734_p6 }
 0x82d   : > { %p1594_p0 = por %p1593_p13, %p1592_p12 }
 0x82e   : > { %p1590_p11 = pneg %p1589_p10 }
 0x82f   : > { %p1596_p2 = por %p1595_p1, %p1594_p0 }
 0x831   : > { %p1597_p3 = pnand %p1596_p2, %p1590_p11 }
 0x833   : > { %1600 = shalt.err (!%p1597_p3)
}
 0x834   : > { %s1643_s26 = smov 128   ;;  %s1644_s27 = smov 256  }
 0x835   : > { %s1645_s17 = smov 8  }
 0x836   : > { %1496 = dma.vmem_to_hbm [thread:$0]  (%p1734_p6), %s1988_s21, 256, %s1998_s23, %s2006_s25, %s1643_s26, %s1644_s27, %s1645_s17  }
 0x837 PF: > { %s1287_s28 = sand.u32 1, %s1623_s30   ;;  %p1499_p4 = pnand %p1342_p9, %p1738_p8 }
 0x838   : > { %s1288_s14 = scalar_lea.sflag [#allocation4], %s1287_s28 }
 0x839   : > { %1618 = dma.done.wait (!%p1499_p4), %s1288_s14, 256  }
 0x83a   : > { %1620 = vsyncadd (!%p1499_p4), %s1288_s14, 4294967040  ;;  %p19_p5 = scmp.ge.s32.totalorder %s1719_s15, 4   ;;  %s2062_s30 = smov %s1627_s10 }
 0x83b   : > { %s2063_s10 = smov %s1631_s11  ;;  %s2064_s11 = smov %s1732_s18 }
 0x83c   : > { %s2065_s12 = smov %s1719_s15  ;;  %21 = sbr.rel (!%p19_p5) target bundleno = 3 (0x3), region = 142 }
 0x843   :  { %1293 = vsyncpa [#allocation4], 1 }
 0x844   :  { %1295 = vsyncpa [#allocation4 + $0x1], 1 }

</bundles_post_ra>
